<compile_context>
chip_gen: v5e
topology: v5e:2x2
jax: 0.10.0
libtpu: 0.0.40
codegen_flags: <defaults>
</compile_context>

<pallas_src>
import functools

import jax
import jax.numpy as jnp
from jax.experimental import pallas as pl
from jax.experimental.pallas import tpu as pltpu

NEG_SLOPE = 0.01  # nn.LeakyReLU default negative slope


def _resblock_kernel(x_ref, w1_ref, b1_ref, w2_ref, b2_ref, out_ref,
                     xpad_ref, patch_ref, *, W, k, pad_lanes):
    """Fused ResBlock on one batch-block, channel-major layout.

    x_ref:     (B, C, H*W)             input activations
    w*_ref:    (F, k*k*C)              weights, reduction rows ordered (kh, kw, c)
    b*_ref:    (F, 1)                  biases
    out_ref:   (B, C, H*W)             output (C == F)
    xpad_ref:  VMEM (C, 2*pad + H*W)   flat zero-padded single-image scratch
    patch_ref: VMEM (k*k*C, B*H*W)     transposed im2col patch (lane-dense rows)
    """
    B, C, HW = x_ref.shape
    p = k // 2
    A = pad_lanes                       # lane offset of the image interior

    # Zero the padded scratch ONCE: only the two pad regions (lanes [0, A) and
    # [A+HW, end)) rely on this staying zero -- they provide the zero H-pad.
    # The interior [A, A+HW) is fully rewritten for every image before it is
    # read, and nothing below ever writes into the pad regions.
    xpad_ref[...] = jnp.zeros(xpad_ref.shape, xpad_ref.dtype)

    # w-position masks for the circular W wrap, hoisted out of all loops.
    lane = jax.lax.broadcasted_iota(jnp.int32, (C, HW), 1)
    if (W & (W - 1)) == 0:              # W power of two -> cheap bitwise path
        wpos = lane & (W - 1)
    else:
        wpos = lane % W
    wrap_mask = {}
    for dw in range(-p, p + 1):
        if dw > 0:
            wrap_mask[dw] = wpos >= (W - dw)
        elif dw < 0:
            wrap_mask[dw] = wpos < (-dw)

    def fill_patch(a, n):
        """a: (C, HW) f32 activation of image n -> write its im2col rows."""
        xpad_ref[:, pl.ds(A, HW)] = a   # lane-aligned interior store
        for kh in range(k):             # static unroll over taps
            dh = kh - p
            for kw in range(k):
                dw = kw - p
                t = kh * k + kw
                # Window reading source (h+dh, w+dw): out-of-range h lands in
                # the zero pad; the circular W wrap is fixed by a lane select
                # against a window shifted by one full row.
                main = xpad_ref[:, pl.ds(A + dh * W + dw, HW)]
                if dw == 0:
                    shifted = main
                else:
                    alt_off = A + dh * W + dw + (-W if dw > 0 else W)
                    alt = xpad_ref[:, pl.ds(alt_off, HW)]
                    shifted = jnp.where(wrap_mask[dw], alt, main)
                # Full-lane (C, HW) row store into the transposed im2col patch.
                patch_ref[t * C:(t + 1) * C, n * HW:(n + 1) * HW] = shifted

    def conv_block(acts, w_ref, b_ref):
        """acts: list of B (C, HW) f32 values -> (F, B*HW) f32 value."""
        for n, a in enumerate(acts):
            fill_patch(a, n)
        # One lane-dense MXU matmul: (F, k*k*C) @ (k*k*C, B*HW) -> (F, B*HW).
        y = jnp.dot(w_ref[...], patch_ref[...],
                    preferred_element_type=jnp.float32)
        y = y + b_ref[...]                            # (F, 1) bias broadcast
        return jnp.where(y >= 0, y, NEG_SLOPE * y)    # LeakyReLU(0.01)

    xs = [x_ref[n].astype(jnp.float32) for n in range(B)]   # static unroll, B <= 2
    y1 = conv_block(xs, w1_ref, b1_ref)               # ConvBlock 1 (stays on-chip)
    y2 = conv_block([y1[:, n * HW:(n + 1) * HW] for n in range(B)],
                    w2_ref, b2_ref)                   # ConvBlock 2
    for n in range(B):                                # fused residual skip
        out_ref[n, :, :] = (xs[n] + y2[:, n * HW:(n + 1) * HW]).astype(out_ref.dtype)


def _tensorcores_per_chip():
    """Best-effort: v7x has 2 TensorCores/chip, v5e/v6e have 1 (safe fallback 1)."""
    try:
        kind = jax.devices()[0].device_kind.lower()
    except Exception:
        return 1
    return 2 if ("v7" in kind or "7x" in kind) else 1


def res_block(x_nchw, w1_oihw, b1, w2_oihw, b2):
    """ResBlock forward. x: (N,C,H,W). Weights in PyTorch OIHW (F,C,k,k), biases (F,)."""
    N, C, H, W = x_nchw.shape
    F, Cin, k, _ = w1_oihw.shape
    assert C == Cin == F, "ResBlock uses in_channels == filters"
    p = k // 2
    HW = H * W

    x_flat = x_nchw.reshape(N, C, HW)                 # free reshape (no transpose)
    # OIHW -> (O, kh, kw, I) -> (F, k*k*C): rows ordered (kh, kw, c) to match patch.
    w1_2d = jnp.transpose(w1_oihw, (0, 2, 3, 1)).reshape(F, k * k * C)
    w2_2d = jnp.transpose(w2_oihw, (0, 2, 3, 1)).reshape(F, k * k * C)
    b1_2d = b1.reshape(F, 1)
    b2_2d = b2.reshape(F, 1)

    # Whole batch in one grid step on single-TC chips; 2 parallel blocks on v7x.
    G = 2 if (_tensorcores_per_chip() >= 2 and N % 2 == 0) else 1
    B = N // G

    # Lane pad around the flat image: >= p*(W+1) so every tap window (incl. the
    # wrap-corrected one) stays in range, rounded up to 128 so the interior
    # store is lane-aligned.
    A = ((p * (W + 1) + 127) // 128) * 128

    out = pl.pallas_call(
        functools.partial(_resblock_kernel, W=W, k=k, pad_lanes=A),
        out_shape=jax.ShapeDtypeStruct((N, C, HW), x_nchw.dtype),
        grid_spec=pltpu.PrefetchScalarGridSpec(
            num_scalar_prefetch=0,
            grid=(G,),
            in_specs=[
                pl.BlockSpec((B, C, HW), lambda g: (g, 0, 0)),
                pl.BlockSpec((F, k * k * C), lambda g: (0, 0)),
                pl.BlockSpec((F, 1), lambda g: (0, 0)),
                pl.BlockSpec((F, k * k * C), lambda g: (0, 0)),
                pl.BlockSpec((F, 1), lambda g: (0, 0)),
            ],
            out_specs=pl.BlockSpec((B, C, HW), lambda g: (g, 0, 0)),
            scratch_shapes=[
                pltpu.VMEM((C, 2 * A + HW), jnp.float32),      # padded flat image
                pltpu.VMEM((k * k * C, B * HW), jnp.float32),  # im2col patch
            ],
        ),
        compiler_params=pltpu.CompilerParams(
            dimension_semantics=("parallel",)),
    )(x_flat, w1_2d, b1_2d, w2_2d, b2_2d)

    return out.reshape(N, C, H, W)                    # free reshape back to NCHW


# ----------------------- reference (pure JAX) for sanity -----------------------
def _pad_hw_nchw(x, p):
    """Zero-pad H by p (top/bottom), then circular-pad W by p (matches PyTorch)."""
    if p == 0:
        return x
    x = jnp.pad(x, ((0, 0), (0, 0), (p, p), (0, 0)))
    return jnp.concatenate([x[..., -p:], x, x[..., :p]], axis=3)


def _ref_conv_block(x, w_oihw, bias):
    p = w_oihw.shape[2] // 2
    xp = _pad_hw_nchw(x, p)
    y = jax.lax.conv_general_dilated(
        xp, w_oihw, window_strides=(1, 1), padding="VALID",
        dimension_numbers=("NCHW", "OIHW", "NCHW"))
    y = y + bias.reshape(1, -1, 1, 1)
    return jnp.where(y >= 0, y, NEG_SLOPE * y)


def _ref_res_block(x, w1, b1, w2, b2):
    h = _ref_conv_block(x, w1, b1)
    return x + _ref_conv_block(h, w2, b2)


if __name__ == "__main__":
    # Small shapes consistent with the module: batch=2, filters=4, 16x16, kernel=3.
    N, F, H, W, K = 2, 4, 16, 16, 3
    key = jax.random.PRNGKey(0)
    kx, kw1, kb1, kw2, kb2 = jax.random.split(key, 5)

    x = jax.random.normal(kx, (N, F, H, W), dtype=jnp.float32)          # NCHW input
    # Conv2d(filters, filters, kernel) weights in PyTorch OIHW layout.
    w1 = jax.random.normal(kw1, (F, F, K, K), dtype=jnp.float32) * 0.1
    b1 = jax.random.normal(kb1, (F,), dtype=jnp.float32) * 0.1
    w2 = jax.random.normal(kw2, (F, F, K, K), dtype=jnp.float32) * 0.1
    b2 = jax.random.normal(kb2, (F,), dtype=jnp.float32) * 0.1

    out = jax.block_until_ready(res_block(x, w1, b1, w2, b2))
    ref = jax.block_until_ready(_ref_res_block(x, w1, b1, w2, b2))

    assert out.shape == x.shape and out.dtype == x.dtype
    assert jnp.allclose(out, ref, atol=1e-4, rtol=1e-4), "mismatch vs JAX reference"
    print("KERNEL_OK")
</pallas_src>

<mosaic_0001>
module attributes {stable_mosaic.version = 11 : i64} {
  func.func @_resblock_kernel(%arg0: i32, %arg1: memref<2x4x256xf32, #tpu.memory_space<vmem>>, %arg2: memref<4x36xf32, #tpu.memory_space<vmem>>, %arg3: memref<4x1xf32, #tpu.memory_space<vmem>>, %arg4: memref<4x36xf32, #tpu.memory_space<vmem>>, %arg5: memref<4x1xf32, #tpu.memory_space<vmem>>, %arg6: memref<2x4x256xf32, #tpu.memory_space<vmem>>, %arg7: memref<4x512xf32, #tpu.memory_space<vmem>>, %arg8: memref<36x512xf32, #tpu.memory_space<vmem>>) attributes {dimension_semantics = [#tpu.dimension_semantics<parallel>], iteration_bounds = array<i64: 1>, scalar_prefetch = 0 : i64, scratch_operands = 2 : i64, tpu.core_type = #tpu.core_type<tc>, window_params = [{transform_indices = @transform_0, window_bounds = array<i64: 2, 4, 256>}, {pipeline_mode = #tpu.pipeline_mode<synchronous>, transform_indices = @transform_1, window_bounds = array<i64: 4, 36>}, {pipeline_mode = #tpu.pipeline_mode<synchronous>, transform_indices = @transform_2, window_bounds = array<i64: 4, 1>}, {pipeline_mode = #tpu.pipeline_mode<synchronous>, transform_indices = @transform_3, window_bounds = array<i64: 4, 36>}, {pipeline_mode = #tpu.pipeline_mode<synchronous>, transform_indices = @transform_4, window_bounds = array<i64: 4, 1>}, {transform_indices = @transform_5, window_bounds = array<i64: 2, 4, 256>}]} {
    %cst = arith.constant 0.000000e+00 : f32
    %0 = vector.broadcast %cst : f32 to vector<4x512xf32>
    %c0 = arith.constant 0 : index
    %c0_0 = arith.constant 0 : index
    %1 = vector.load %arg7[%c0, %c0_0] : memref<4x512xf32, #tpu.memory_space<vmem>>, vector<4x512xf32>
    tpu.vector_store %arg7[%c0, %c0_0], %0 {strides = array<i32>} : memref<4x512xf32, #tpu.memory_space<vmem>>, vector<4x512xf32>,
    %2 = tpu.iota {dimensions = array<i32: 1>} : vector<4x256xi32>
    %c15_i32 = arith.constant 15 : i32
    %3 = vector.broadcast %c15_i32 : i32 to vector<4x256xi32>
    %4 = arith.andi %2, %3 : vector<4x256xi32>
    %c1_i32 = arith.constant 1 : i32
    %5 = vector.broadcast %c1_i32 : i32 to vector<4x256xi32>
    %6 = arith.cmpi slt, %4, %5 : vector<4x256xi32>
    %c15_i32_1 = arith.constant 15 : i32
    %7 = vector.broadcast %c15_i32_1 : i32 to vector<4x256xi32>
    %8 = arith.cmpi sge, %4, %7 : vector<4x256xi32>
    %c0_2 = arith.constant 0 : index
    %c0_3 = arith.constant 0 : index
    %c0_4 = arith.constant 0 : index
    %9 = vector.load %arg1[%c0_2, %c0_3, %c0_4] : memref<2x4x256xf32, #tpu.memory_space<vmem>>, vector<1x4x256xf32>
    %10 = vector.shape_cast %9 : vector<1x4x256xf32> to vector<4x256xf32>
    %c1 = arith.constant 1 : index
    %c0_5 = arith.constant 0 : index
    %c0_6 = arith.constant 0 : index
    %11 = vector.load %arg1[%c1, %c0_5, %c0_6] : memref<2x4x256xf32, #tpu.memory_space<vmem>>, vector<1x4x256xf32>
    %12 = vector.shape_cast %11 : vector<1x4x256xf32> to vector<4x256xf32>
    %c0_7 = arith.constant 0 : index
    %c128 = arith.constant 128 : index
    %13 = vector.load %arg7[%c0_7, %c128] : memref<4x512xf32, #tpu.memory_space<vmem>>, vector<4x256xf32>
    tpu.vector_store %arg7[%c0_7, %c128], %10 {strides = array<i32>} : memref<4x512xf32, #tpu.memory_space<vmem>>, vector<4x256xf32>,
    %c0_8 = arith.constant 0 : index
    %c111 = arith.constant 111 : index
    %14 = vector.load %arg7[%c0_8, %c111] : memref<4x512xf32, #tpu.memory_space<vmem>>, vector<4x256xf32>
    %c0_9 = arith.constant 0 : index
    %c127 = arith.constant 127 : index
    %15 = vector.load %arg7[%c0_9, %c127] : memref<4x512xf32, #tpu.memory_space<vmem>>, vector<4x256xf32>
    %16 = arith.select %6, %15, %14 : vector<4x256xi1>, vector<4x256xf32>
    %c0_10 = arith.constant 0 : index
    %c0_11 = arith.constant 0 : index
    %17 = vector.load %arg8[%c0_10, %c0_11] : memref<36x512xf32, #tpu.memory_space<vmem>>, vector<4x256xf32>
    tpu.vector_store %arg8[%c0_10, %c0_11], %16 {strides = array<i32>} : memref<36x512xf32, #tpu.memory_space<vmem>>, vector<4x256xf32>,
    %c0_12 = arith.constant 0 : index
    %c112 = arith.constant 112 : index
    %18 = vector.load %arg7[%c0_12, %c112] : memref<4x512xf32, #tpu.memory_space<vmem>>, vector<4x256xf32>
    %c4 = arith.constant 4 : index
    %c0_13 = arith.constant 0 : index
    %19 = vector.load %arg8[%c4, %c0_13] : memref<36x512xf32, #tpu.memory_space<vmem>>, vector<4x256xf32>
    tpu.vector_store %arg8[%c4, %c0_13], %18 {strides = array<i32>} : memref<36x512xf32, #tpu.memory_space<vmem>>, vector<4x256xf32>,
    %c0_14 = arith.constant 0 : index
    %c113 = arith.constant 113 : index
    %20 = vector.load %arg7[%c0_14, %c113] : memref<4x512xf32, #tpu.memory_space<vmem>>, vector<4x256xf32>
    %c0_15 = arith.constant 0 : index
    %c97 = arith.constant 97 : index
    %21 = vector.load %arg7[%c0_15, %c97] : memref<4x512xf32, #tpu.memory_space<vmem>>, vector<4x256xf32>
    %22 = arith.select %8, %21, %20 : vector<4x256xi1>, vector<4x256xf32>
    %c8 = arith.constant 8 : index
    %c0_16 = arith.constant 0 : index
    %23 = vector.load %arg8[%c8, %c0_16] : memref<36x512xf32, #tpu.memory_space<vmem>>, vector<4x256xf32>
    tpu.vector_store %arg8[%c8, %c0_16], %22 {strides = array<i32>} : memref<36x512xf32, #tpu.memory_space<vmem>>, vector<4x256xf32>,
    %c0_17 = arith.constant 0 : index
    %c127_18 = arith.constant 127 : index
    %24 = vector.load %arg7[%c0_17, %c127_18] : memref<4x512xf32, #tpu.memory_space<vmem>>, vector<4x256xf32>
    %c0_19 = arith.constant 0 : index
    %c143 = arith.constant 143 : index
    %25 = vector.load %arg7[%c0_19, %c143] : memref<4x512xf32, #tpu.memory_space<vmem>>, vector<4x256xf32>
    %26 = arith.select %6, %25, %24 : vector<4x256xi1>, vector<4x256xf32>
    %c12 = arith.constant 12 : index
    %c0_20 = arith.constant 0 : index
    %27 = vector.load %arg8[%c12, %c0_20] : memref<36x512xf32, #tpu.memory_space<vmem>>, vector<4x256xf32>
    tpu.vector_store %arg8[%c12, %c0_20], %26 {strides = array<i32>} : memref<36x512xf32, #tpu.memory_space<vmem>>, vector<4x256xf32>,
    %c0_21 = arith.constant 0 : index
    %c128_22 = arith.constant 128 : index
    %28 = vector.load %arg7[%c0_21, %c128_22] : memref<4x512xf32, #tpu.memory_space<vmem>>, vector<4x256xf32>
    %c16 = arith.constant 16 : index
    %c0_23 = arith.constant 0 : index
    %29 = vector.load %arg8[%c16, %c0_23] : memref<36x512xf32, #tpu.memory_space<vmem>>, vector<4x256xf32>
    tpu.vector_store %arg8[%c16, %c0_23], %28 {strides = array<i32>} : memref<36x512xf32, #tpu.memory_space<vmem>>, vector<4x256xf32>,
    %c0_24 = arith.constant 0 : index
    %c129 = arith.constant 129 : index
    %30 = vector.load %arg7[%c0_24, %c129] : memref<4x512xf32, #tpu.memory_space<vmem>>, vector<4x256xf32>
    %c0_25 = arith.constant 0 : index
    %c113_26 = arith.constant 113 : index
    %31 = vector.load %arg7[%c0_25, %c113_26] : memref<4x512xf32, #tpu.memory_space<vmem>>, vector<4x256xf32>
    %32 = arith.select %8, %31, %30 : vector<4x256xi1>, vector<4x256xf32>
    %c20 = arith.constant 20 : index
    %c0_27 = arith.constant 0 : index
    %33 = vector.load %arg8[%c20, %c0_27] : memref<36x512xf32, #tpu.memory_space<vmem>>, vector<4x256xf32>
    tpu.vector_store %arg8[%c20, %c0_27], %32 {strides = array<i32>} : memref<36x512xf32, #tpu.memory_space<vmem>>, vector<4x256xf32>,
    %c0_28 = arith.constant 0 : index
    %c143_29 = arith.constant 143 : index
    %34 = vector.load %arg7[%c0_28, %c143_29] : memref<4x512xf32, #tpu.memory_space<vmem>>, vector<4x256xf32>
    %c0_30 = arith.constant 0 : index
    %c159 = arith.constant 159 : index
    %35 = vector.load %arg7[%c0_30, %c159] : memref<4x512xf32, #tpu.memory_space<vmem>>, vector<4x256xf32>
    %36 = arith.select %6, %35, %34 : vector<4x256xi1>, vector<4x256xf32>
    %c24 = arith.constant 24 : index
    %c0_31 = arith.constant 0 : index
    %37 = vector.load %arg8[%c24, %c0_31] : memref<36x512xf32, #tpu.memory_space<vmem>>, vector<4x256xf32>
    tpu.vector_store %arg8[%c24, %c0_31], %36 {strides = array<i32>} : memref<36x512xf32, #tpu.memory_space<vmem>>, vector<4x256xf32>,
    %c0_32 = arith.constant 0 : index
    %c144 = arith.constant 144 : index
    %38 = vector.load %arg7[%c0_32, %c144] : memref<4x512xf32, #tpu.memory_space<vmem>>, vector<4x256xf32>
    %c28 = arith.constant 28 : index
    %c0_33 = arith.constant 0 : index
    %39 = vector.load %arg8[%c28, %c0_33] : memref<36x512xf32, #tpu.memory_space<vmem>>, vector<4x256xf32>
    tpu.vector_store %arg8[%c28, %c0_33], %38 {strides = array<i32>} : memref<36x512xf32, #tpu.memory_space<vmem>>, vector<4x256xf32>,
    %c0_34 = arith.constant 0 : index
    %c145 = arith.constant 145 : index
    %40 = vector.load %arg7[%c0_34, %c145] : memref<4x512xf32, #tpu.memory_space<vmem>>, vector<4x256xf32>
    %c0_35 = arith.constant 0 : index
    %c129_36 = arith.constant 129 : index
    %41 = vector.load %arg7[%c0_35, %c129_36] : memref<4x512xf32, #tpu.memory_space<vmem>>, vector<4x256xf32>
    %42 = arith.select %8, %41, %40 : vector<4x256xi1>, vector<4x256xf32>
    %c32 = arith.constant 32 : index
    %c0_37 = arith.constant 0 : index
    %43 = vector.load %arg8[%c32, %c0_37] : memref<36x512xf32, #tpu.memory_space<vmem>>, vector<4x256xf32>
    tpu.vector_store %arg8[%c32, %c0_37], %42 {strides = array<i32>} : memref<36x512xf32, #tpu.memory_space<vmem>>, vector<4x256xf32>,
    %c0_38 = arith.constant 0 : index
    %c128_39 = arith.constant 128 : index
    %44 = vector.load %arg7[%c0_38, %c128_39] : memref<4x512xf32, #tpu.memory_space<vmem>>, vector<4x256xf32>
    tpu.vector_store %arg7[%c0_38, %c128_39], %12 {strides = array<i32>} : memref<4x512xf32, #tpu.memory_space<vmem>>, vector<4x256xf32>,
    %c0_40 = arith.constant 0 : index
    %c111_41 = arith.constant 111 : index
    %45 = vector.load %arg7[%c0_40, %c111_41] : memref<4x512xf32, #tpu.memory_space<vmem>>, vector<4x256xf32>
    %c0_42 = arith.constant 0 : index
    %c127_43 = arith.constant 127 : index
    %46 = vector.load %arg7[%c0_42, %c127_43] : memref<4x512xf32, #tpu.memory_space<vmem>>, vector<4x256xf32>
    %47 = arith.select %6, %46, %45 : vector<4x256xi1>, vector<4x256xf32>
    %c0_44 = arith.constant 0 : index
    %c256 = arith.constant 256 : index
    %48 = vector.load %arg8[%c0_44, %c256] : memref<36x512xf32, #tpu.memory_space<vmem>>, vector<4x256xf32>
    tpu.vector_store %arg8[%c0_44, %c256], %47 {strides = array<i32>} : memref<36x512xf32, #tpu.memory_space<vmem>>, vector<4x256xf32>,
    %c0_45 = arith.constant 0 : index
    %c112_46 = arith.constant 112 : index
    %49 = vector.load %arg7[%c0_45, %c112_46] : memref<4x512xf32, #tpu.memory_space<vmem>>, vector<4x256xf32>
    %c4_47 = arith.constant 4 : index
    %c256_48 = arith.constant 256 : index
    %50 = vector.load %arg8[%c4_47, %c256_48] : memref<36x512xf32, #tpu.memory_space<vmem>>, vector<4x256xf32>
    tpu.vector_store %arg8[%c4_47, %c256_48], %49 {strides = array<i32>} : memref<36x512xf32, #tpu.memory_space<vmem>>, vector<4x256xf32>,
    %c0_49 = arith.constant 0 : index
    %c113_50 = arith.constant 113 : index
    %51 = vector.load %arg7[%c0_49, %c113_50] : memref<4x512xf32, #tpu.memory_space<vmem>>, vector<4x256xf32>
    %c0_51 = arith.constant 0 : index
    %c97_52 = arith.constant 97 : index
    %52 = vector.load %arg7[%c0_51, %c97_52] : memref<4x512xf32, #tpu.memory_space<vmem>>, vector<4x256xf32>
    %53 = arith.select %8, %52, %51 : vector<4x256xi1>, vector<4x256xf32>
    %c8_53 = arith.constant 8 : index
    %c256_54 = arith.constant 256 : index
    %54 = vector.load %arg8[%c8_53, %c256_54] : memref<36x512xf32, #tpu.memory_space<vmem>>, vector<4x256xf32>
    tpu.vector_store %arg8[%c8_53, %c256_54], %53 {strides = array<i32>} : memref<36x512xf32, #tpu.memory_space<vmem>>, vector<4x256xf32>,
    %c0_55 = arith.constant 0 : index
    %c127_56 = arith.constant 127 : index
    %55 = vector.load %arg7[%c0_55, %c127_56] : memref<4x512xf32, #tpu.memory_space<vmem>>, vector<4x256xf32>
    %c0_57 = arith.constant 0 : index
    %c143_58 = arith.constant 143 : index
    %56 = vector.load %arg7[%c0_57, %c143_58] : memref<4x512xf32, #tpu.memory_space<vmem>>, vector<4x256xf32>
    %57 = arith.select %6, %56, %55 : vector<4x256xi1>, vector<4x256xf32>
    %c12_59 = arith.constant 12 : index
    %c256_60 = arith.constant 256 : index
    %58 = vector.load %arg8[%c12_59, %c256_60] : memref<36x512xf32, #tpu.memory_space<vmem>>, vector<4x256xf32>
    tpu.vector_store %arg8[%c12_59, %c256_60], %57 {strides = array<i32>} : memref<36x512xf32, #tpu.memory_space<vmem>>, vector<4x256xf32>,
    %c0_61 = arith.constant 0 : index
    %c128_62 = arith.constant 128 : index
    %59 = vector.load %arg7[%c0_61, %c128_62] : memref<4x512xf32, #tpu.memory_space<vmem>>, vector<4x256xf32>
    %c16_63 = arith.constant 16 : index
    %c256_64 = arith.constant 256 : index
    %60 = vector.load %arg8[%c16_63, %c256_64] : memref<36x512xf32, #tpu.memory_space<vmem>>, vector<4x256xf32>
    tpu.vector_store %arg8[%c16_63, %c256_64], %59 {strides = array<i32>} : memref<36x512xf32, #tpu.memory_space<vmem>>, vector<4x256xf32>,
    %c0_65 = arith.constant 0 : index
    %c129_66 = arith.constant 129 : index
    %61 = vector.load %arg7[%c0_65, %c129_66] : memref<4x512xf32, #tpu.memory_space<vmem>>, vector<4x256xf32>
    %c0_67 = arith.constant 0 : index
    %c113_68 = arith.constant 113 : index
    %62 = vector.load %arg7[%c0_67, %c113_68] : memref<4x512xf32, #tpu.memory_space<vmem>>, vector<4x256xf32>
    %63 = arith.select %8, %62, %61 : vector<4x256xi1>, vector<4x256xf32>
    %c20_69 = arith.constant 20 : index
    %c256_70 = arith.constant 256 : index
    %64 = vector.load %arg8[%c20_69, %c256_70] : memref<36x512xf32, #tpu.memory_space<vmem>>, vector<4x256xf32>
    tpu.vector_store %arg8[%c20_69, %c256_70], %63 {strides = array<i32>} : memref<36x512xf32, #tpu.memory_space<vmem>>, vector<4x256xf32>,
    %c0_71 = arith.constant 0 : index
    %c143_72 = arith.constant 143 : index
    %65 = vector.load %arg7[%c0_71, %c143_72] : memref<4x512xf32, #tpu.memory_space<vmem>>, vector<4x256xf32>
    %c0_73 = arith.constant 0 : index
    %c159_74 = arith.constant 159 : index
    %66 = vector.load %arg7[%c0_73, %c159_74] : memref<4x512xf32, #tpu.memory_space<vmem>>, vector<4x256xf32>
    %67 = arith.select %6, %66, %65 : vector<4x256xi1>, vector<4x256xf32>
    %c24_75 = arith.constant 24 : index
    %c256_76 = arith.constant 256 : index
    %68 = vector.load %arg8[%c24_75, %c256_76] : memref<36x512xf32, #tpu.memory_space<vmem>>, vector<4x256xf32>
    tpu.vector_store %arg8[%c24_75, %c256_76], %67 {strides = array<i32>} : memref<36x512xf32, #tpu.memory_space<vmem>>, vector<4x256xf32>,
    %c0_77 = arith.constant 0 : index
    %c144_78 = arith.constant 144 : index
    %69 = vector.load %arg7[%c0_77, %c144_78] : memref<4x512xf32, #tpu.memory_space<vmem>>, vector<4x256xf32>
    %c28_79 = arith.constant 28 : index
    %c256_80 = arith.constant 256 : index
    %70 = vector.load %arg8[%c28_79, %c256_80] : memref<36x512xf32, #tpu.memory_space<vmem>>, vector<4x256xf32>
    tpu.vector_store %arg8[%c28_79, %c256_80], %69 {strides = array<i32>} : memref<36x512xf32, #tpu.memory_space<vmem>>, vector<4x256xf32>,
    %c0_81 = arith.constant 0 : index
    %c145_82 = arith.constant 145 : index
    %71 = vector.load %arg7[%c0_81, %c145_82] : memref<4x512xf32, #tpu.memory_space<vmem>>, vector<4x256xf32>
    %c0_83 = arith.constant 0 : index
    %c129_84 = arith.constant 129 : index
    %72 = vector.load %arg7[%c0_83, %c129_84] : memref<4x512xf32, #tpu.memory_space<vmem>>, vector<4x256xf32>
    %73 = arith.select %8, %72, %71 : vector<4x256xi1>, vector<4x256xf32>
    %c32_85 = arith.constant 32 : index
    %c256_86 = arith.constant 256 : index
    %74 = vector.load %arg8[%c32_85, %c256_86] : memref<36x512xf32, #tpu.memory_space<vmem>>, vector<4x256xf32>
    tpu.vector_store %arg8[%c32_85, %c256_86], %73 {strides = array<i32>} : memref<36x512xf32, #tpu.memory_space<vmem>>, vector<4x256xf32>,
    %c0_87 = arith.constant 0 : index
    %c0_88 = arith.constant 0 : index
    %75 = vector.load %arg2[%c0_87, %c0_88] : memref<4x36xf32, #tpu.memory_space<vmem>>, vector<4x36xf32>
    %c0_89 = arith.constant 0 : index
    %c0_90 = arith.constant 0 : index
    %76 = vector.load %arg8[%c0_89, %c0_90] : memref<36x512xf32, #tpu.memory_space<vmem>>, vector<36x512xf32>
    %cst_91 = arith.constant dense<0.000000e+00> : vector<4x512xf32>
    %77 = tpu.matmul %75, %76, %cst_91 {dimension_numbers = #tpu.dot_dimension_numbers<[1], [0], [0], [1], [0, 0, 1, 1], [], []>} : vector<4x36xf32>, vector<36x512xf32>, vector<4x512xf32> -> vector<4x512xf32>
    %c0_92 = arith.constant 0 : index
    %c0_93 = arith.constant 0 : index
    %78 = vector.load %arg3[%c0_92, %c0_93] : memref<4x1xf32, #tpu.memory_space<vmem>>, vector<4x1xf32>
    %79 = vector.broadcast %78 : vector<4x1xf32> to vector<4x512xf32>
    %80 = arith.addf %77, %79 : vector<4x512xf32>
    %cst_94 = arith.constant 0.000000e+00 : f32
    %81 = vector.broadcast %cst_94 : f32 to vector<4x512xf32>
    %82 = arith.cmpf oge, %80, %81 : vector<4x512xf32>
    %cst_95 = arith.constant 0.00999999977 : f32
    %83 = vector.broadcast %cst_95 : f32 to vector<4x512xf32>
    %84 = arith.mulf %83, %80 : vector<4x512xf32>
    %85 = arith.select %82, %80, %84 : vector<4x512xi1>, vector<4x512xf32>
    %86 = vector.extract_strided_slice %85 {offsets = [0, 0], sizes = [4, 256], strides = [1, 1]} : vector<4x512xf32> to vector<4x256xf32>
    %87 = vector.extract_strided_slice %85 {offsets = [0, 256], sizes = [4, 256], strides = [1, 1]} : vector<4x512xf32> to vector<4x256xf32>
    %c0_96 = arith.constant 0 : index
    %c128_97 = arith.constant 128 : index
    %88 = vector.load %arg7[%c0_96, %c128_97] : memref<4x512xf32, #tpu.memory_space<vmem>>, vector<4x256xf32>
    tpu.vector_store %arg7[%c0_96, %c128_97], %86 {strides = array<i32>} : memref<4x512xf32, #tpu.memory_space<vmem>>, vector<4x256xf32>,
    %c0_98 = arith.constant 0 : index
    %c111_99 = arith.constant 111 : index
    %89 = vector.load %arg7[%c0_98, %c111_99] : memref<4x512xf32, #tpu.memory_space<vmem>>, vector<4x256xf32>
    %c0_100 = arith.constant 0 : index
    %c127_101 = arith.constant 127 : index
    %90 = vector.load %arg7[%c0_100, %c127_101] : memref<4x512xf32, #tpu.memory_space<vmem>>, vector<4x256xf32>
    %91 = arith.select %6, %90, %89 : vector<4x256xi1>, vector<4x256xf32>
    %c0_102 = arith.constant 0 : index
    %c0_103 = arith.constant 0 : index
    %92 = vector.load %arg8[%c0_102, %c0_103] : memref<36x512xf32, #tpu.memory_space<vmem>>, vector<4x256xf32>
    tpu.vector_store %arg8[%c0_102, %c0_103], %91 {strides = array<i32>} : memref<36x512xf32, #tpu.memory_space<vmem>>, vector<4x256xf32>,
    %c0_104 = arith.constant 0 : index
    %c112_105 = arith.constant 112 : index
    %93 = vector.load %arg7[%c0_104, %c112_105] : memref<4x512xf32, #tpu.memory_space<vmem>>, vector<4x256xf32>
    %c4_106 = arith.constant 4 : index
    %c0_107 = arith.constant 0 : index
    %94 = vector.load %arg8[%c4_106, %c0_107] : memref<36x512xf32, #tpu.memory_space<vmem>>, vector<4x256xf32>
    tpu.vector_store %arg8[%c4_106, %c0_107], %93 {strides = array<i32>} : memref<36x512xf32, #tpu.memory_space<vmem>>, vector<4x256xf32>,
    %c0_108 = arith.constant 0 : index
    %c113_109 = arith.constant 113 : index
    %95 = vector.load %arg7[%c0_108, %c113_109] : memref<4x512xf32, #tpu.memory_space<vmem>>, vector<4x256xf32>
    %c0_110 = arith.constant 0 : index
    %c97_111 = arith.constant 97 : index
    %96 = vector.load %arg7[%c0_110, %c97_111] : memref<4x512xf32, #tpu.memory_space<vmem>>, vector<4x256xf32>
    %97 = arith.select %8, %96, %95 : vector<4x256xi1>, vector<4x256xf32>
    %c8_112 = arith.constant 8 : index
    %c0_113 = arith.constant 0 : index
    %98 = vector.load %arg8[%c8_112, %c0_113] : memref<36x512xf32, #tpu.memory_space<vmem>>, vector<4x256xf32>
    tpu.vector_store %arg8[%c8_112, %c0_113], %97 {strides = array<i32>} : memref<36x512xf32, #tpu.memory_space<vmem>>, vector<4x256xf32>,
    %c0_114 = arith.constant 0 : index
    %c127_115 = arith.constant 127 : index
    %99 = vector.load %arg7[%c0_114, %c127_115] : memref<4x512xf32, #tpu.memory_space<vmem>>, vector<4x256xf32>
    %c0_116 = arith.constant 0 : index
    %c143_117 = arith.constant 143 : index
    %100 = vector.load %arg7[%c0_116, %c143_117] : memref<4x512xf32, #tpu.memory_space<vmem>>, vector<4x256xf32>
    %101 = arith.select %6, %100, %99 : vector<4x256xi1>, vector<4x256xf32>
    %c12_118 = arith.constant 12 : index
    %c0_119 = arith.constant 0 : index
    %102 = vector.load %arg8[%c12_118, %c0_119] : memref<36x512xf32, #tpu.memory_space<vmem>>, vector<4x256xf32>
    tpu.vector_store %arg8[%c12_118, %c0_119], %101 {strides = array<i32>} : memref<36x512xf32, #tpu.memory_space<vmem>>, vector<4x256xf32>,
    %c0_120 = arith.constant 0 : index
    %c128_121 = arith.constant 128 : index
    %103 = vector.load %arg7[%c0_120, %c128_121] : memref<4x512xf32, #tpu.memory_space<vmem>>, vector<4x256xf32>
    %c16_122 = arith.constant 16 : index
    %c0_123 = arith.constant 0 : index
    %104 = vector.load %arg8[%c16_122, %c0_123] : memref<36x512xf32, #tpu.memory_space<vmem>>, vector<4x256xf32>
    tpu.vector_store %arg8[%c16_122, %c0_123], %103 {strides = array<i32>} : memref<36x512xf32, #tpu.memory_space<vmem>>, vector<4x256xf32>,
    %c0_124 = arith.constant 0 : index
    %c129_125 = arith.constant 129 : index
    %105 = vector.load %arg7[%c0_124, %c129_125] : memref<4x512xf32, #tpu.memory_space<vmem>>, vector<4x256xf32>
    %c0_126 = arith.constant 0 : index
    %c113_127 = arith.constant 113 : index
    %106 = vector.load %arg7[%c0_126, %c113_127] : memref<4x512xf32, #tpu.memory_space<vmem>>, vector<4x256xf32>
    %107 = arith.select %8, %106, %105 : vector<4x256xi1>, vector<4x256xf32>
    %c20_128 = arith.constant 20 : index
    %c0_129 = arith.constant 0 : index
    %108 = vector.load %arg8[%c20_128, %c0_129] : memref<36x512xf32, #tpu.memory_space<vmem>>, vector<4x256xf32>
    tpu.vector_store %arg8[%c20_128, %c0_129], %107 {strides = array<i32>} : memref<36x512xf32, #tpu.memory_space<vmem>>, vector<4x256xf32>,
    %c0_130 = arith.constant 0 : index
    %c143_131 = arith.constant 143 : index
    %109 = vector.load %arg7[%c0_130, %c143_131] : memref<4x512xf32, #tpu.memory_space<vmem>>, vector<4x256xf32>
    %c0_132 = arith.constant 0 : index
    %c159_133 = arith.constant 159 : index
    %110 = vector.load %arg7[%c0_132, %c159_133] : memref<4x512xf32, #tpu.memory_space<vmem>>, vector<4x256xf32>
    %111 = arith.select %6, %110, %109 : vector<4x256xi1>, vector<4x256xf32>
    %c24_134 = arith.constant 24 : index
    %c0_135 = arith.constant 0 : index
    %112 = vector.load %arg8[%c24_134, %c0_135] : memref<36x512xf32, #tpu.memory_space<vmem>>, vector<4x256xf32>
    tpu.vector_store %arg8[%c24_134, %c0_135], %111 {strides = array<i32>} : memref<36x512xf32, #tpu.memory_space<vmem>>, vector<4x256xf32>,
    %c0_136 = arith.constant 0 : index
    %c144_137 = arith.constant 144 : index
    %113 = vector.load %arg7[%c0_136, %c144_137] : memref<4x512xf32, #tpu.memory_space<vmem>>, vector<4x256xf32>
    %c28_138 = arith.constant 28 : index
    %c0_139 = arith.constant 0 : index
    %114 = vector.load %arg8[%c28_138, %c0_139] : memref<36x512xf32, #tpu.memory_space<vmem>>, vector<4x256xf32>
    tpu.vector_store %arg8[%c28_138, %c0_139], %113 {strides = array<i32>} : memref<36x512xf32, #tpu.memory_space<vmem>>, vector<4x256xf32>,
    %c0_140 = arith.constant 0 : index
    %c145_141 = arith.constant 145 : index
    %115 = vector.load %arg7[%c0_140, %c145_141] : memref<4x512xf32, #tpu.memory_space<vmem>>, vector<4x256xf32>
    %c0_142 = arith.constant 0 : index
    %c129_143 = arith.constant 129 : index
    %116 = vector.load %arg7[%c0_142, %c129_143] : memref<4x512xf32, #tpu.memory_space<vmem>>, vector<4x256xf32>
    %117 = arith.select %8, %116, %115 : vector<4x256xi1>, vector<4x256xf32>
    %c32_144 = arith.constant 32 : index
    %c0_145 = arith.constant 0 : index
    %118 = vector.load %arg8[%c32_144, %c0_145] : memref<36x512xf32, #tpu.memory_space<vmem>>, vector<4x256xf32>
    tpu.vector_store %arg8[%c32_144, %c0_145], %117 {strides = array<i32>} : memref<36x512xf32, #tpu.memory_space<vmem>>, vector<4x256xf32>,
    %c0_146 = arith.constant 0 : index
    %c128_147 = arith.constant 128 : index
    %119 = vector.load %arg7[%c0_146, %c128_147] : memref<4x512xf32, #tpu.memory_space<vmem>>, vector<4x256xf32>
    tpu.vector_store %arg7[%c0_146, %c128_147], %87 {strides = array<i32>} : memref<4x512xf32, #tpu.memory_space<vmem>>, vector<4x256xf32>,
    %c0_148 = arith.constant 0 : index
    %c111_149 = arith.constant 111 : index
    %120 = vector.load %arg7[%c0_148, %c111_149] : memref<4x512xf32, #tpu.memory_space<vmem>>, vector<4x256xf32>
    %c0_150 = arith.constant 0 : index
    %c127_151 = arith.constant 127 : index
    %121 = vector.load %arg7[%c0_150, %c127_151] : memref<4x512xf32, #tpu.memory_space<vmem>>, vector<4x256xf32>
    %122 = arith.select %6, %121, %120 : vector<4x256xi1>, vector<4x256xf32>
    %c0_152 = arith.constant 0 : index
    %c256_153 = arith.constant 256 : index
    %123 = vector.load %arg8[%c0_152, %c256_153] : memref<36x512xf32, #tpu.memory_space<vmem>>, vector<4x256xf32>
    tpu.vector_store %arg8[%c0_152, %c256_153], %122 {strides = array<i32>} : memref<36x512xf32, #tpu.memory_space<vmem>>, vector<4x256xf32>,
    %c0_154 = arith.constant 0 : index
    %c112_155 = arith.constant 112 : index
    %124 = vector.load %arg7[%c0_154, %c112_155] : memref<4x512xf32, #tpu.memory_space<vmem>>, vector<4x256xf32>
    %c4_156 = arith.constant 4 : index
    %c256_157 = arith.constant 256 : index
    %125 = vector.load %arg8[%c4_156, %c256_157] : memref<36x512xf32, #tpu.memory_space<vmem>>, vector<4x256xf32>
    tpu.vector_store %arg8[%c4_156, %c256_157], %124 {strides = array<i32>} : memref<36x512xf32, #tpu.memory_space<vmem>>, vector<4x256xf32>,
    %c0_158 = arith.constant 0 : index
    %c113_159 = arith.constant 113 : index
    %126 = vector.load %arg7[%c0_158, %c113_159] : memref<4x512xf32, #tpu.memory_space<vmem>>, vector<4x256xf32>
    %c0_160 = arith.constant 0 : index
    %c97_161 = arith.constant 97 : index
    %127 = vector.load %arg7[%c0_160, %c97_161] : memref<4x512xf32, #tpu.memory_space<vmem>>, vector<4x256xf32>
    %128 = arith.select %8, %127, %126 : vector<4x256xi1>, vector<4x256xf32>
    %c8_162 = arith.constant 8 : index
    %c256_163 = arith.constant 256 : index
    %129 = vector.load %arg8[%c8_162, %c256_163] : memref<36x512xf32, #tpu.memory_space<vmem>>, vector<4x256xf32>
    tpu.vector_store %arg8[%c8_162, %c256_163], %128 {strides = array<i32>} : memref<36x512xf32, #tpu.memory_space<vmem>>, vector<4x256xf32>,
    %c0_164 = arith.constant 0 : index
    %c127_165 = arith.constant 127 : index
    %130 = vector.load %arg7[%c0_164, %c127_165] : memref<4x512xf32, #tpu.memory_space<vmem>>, vector<4x256xf32>
    %c0_166 = arith.constant 0 : index
    %c143_167 = arith.constant 143 : index
    %131 = vector.load %arg7[%c0_166, %c143_167] : memref<4x512xf32, #tpu.memory_space<vmem>>, vector<4x256xf32>
    %132 = arith.select %6, %131, %130 : vector<4x256xi1>, vector<4x256xf32>
    %c12_168 = arith.constant 12 : index
    %c256_169 = arith.constant 256 : index
    %133 = vector.load %arg8[%c12_168, %c256_169] : memref<36x512xf32, #tpu.memory_space<vmem>>, vector<4x256xf32>
    tpu.vector_store %arg8[%c12_168, %c256_169], %132 {strides = array<i32>} : memref<36x512xf32, #tpu.memory_space<vmem>>, vector<4x256xf32>,
    %c0_170 = arith.constant 0 : index
    %c128_171 = arith.constant 128 : index
    %134 = vector.load %arg7[%c0_170, %c128_171] : memref<4x512xf32, #tpu.memory_space<vmem>>, vector<4x256xf32>
    %c16_172 = arith.constant 16 : index
    %c256_173 = arith.constant 256 : index
    %135 = vector.load %arg8[%c16_172, %c256_173] : memref<36x512xf32, #tpu.memory_space<vmem>>, vector<4x256xf32>
    tpu.vector_store %arg8[%c16_172, %c256_173], %134 {strides = array<i32>} : memref<36x512xf32, #tpu.memory_space<vmem>>, vector<4x256xf32>,
    %c0_174 = arith.constant 0 : index
    %c129_175 = arith.constant 129 : index
    %136 = vector.load %arg7[%c0_174, %c129_175] : memref<4x512xf32, #tpu.memory_space<vmem>>, vector<4x256xf32>
    %c0_176 = arith.constant 0 : index
    %c113_177 = arith.constant 113 : index
    %137 = vector.load %arg7[%c0_176, %c113_177] : memref<4x512xf32, #tpu.memory_space<vmem>>, vector<4x256xf32>
    %138 = arith.select %8, %137, %136 : vector<4x256xi1>, vector<4x256xf32>
    %c20_178 = arith.constant 20 : index
    %c256_179 = arith.constant 256 : index
    %139 = vector.load %arg8[%c20_178, %c256_179] : memref<36x512xf32, #tpu.memory_space<vmem>>, vector<4x256xf32>
    tpu.vector_store %arg8[%c20_178, %c256_179], %138 {strides = array<i32>} : memref<36x512xf32, #tpu.memory_space<vmem>>, vector<4x256xf32>,
    %c0_180 = arith.constant 0 : index
    %c143_181 = arith.constant 143 : index
    %140 = vector.load %arg7[%c0_180, %c143_181] : memref<4x512xf32, #tpu.memory_space<vmem>>, vector<4x256xf32>
    %c0_182 = arith.constant 0 : index
    %c159_183 = arith.constant 159 : index
    %141 = vector.load %arg7[%c0_182, %c159_183] : memref<4x512xf32, #tpu.memory_space<vmem>>, vector<4x256xf32>
    %142 = arith.select %6, %141, %140 : vector<4x256xi1>, vector<4x256xf32>
    %c24_184 = arith.constant 24 : index
    %c256_185 = arith.constant 256 : index
    %143 = vector.load %arg8[%c24_184, %c256_185] : memref<36x512xf32, #tpu.memory_space<vmem>>, vector<4x256xf32>
    tpu.vector_store %arg8[%c24_184, %c256_185], %142 {strides = array<i32>} : memref<36x512xf32, #tpu.memory_space<vmem>>, vector<4x256xf32>,
    %c0_186 = arith.constant 0 : index
    %c144_187 = arith.constant 144 : index
    %144 = vector.load %arg7[%c0_186, %c144_187] : memref<4x512xf32, #tpu.memory_space<vmem>>, vector<4x256xf32>
    %c28_188 = arith.constant 28 : index
    %c256_189 = arith.constant 256 : index
    %145 = vector.load %arg8[%c28_188, %c256_189] : memref<36x512xf32, #tpu.memory_space<vmem>>, vector<4x256xf32>
    tpu.vector_store %arg8[%c28_188, %c256_189], %144 {strides = array<i32>} : memref<36x512xf32, #tpu.memory_space<vmem>>, vector<4x256xf32>,
    %c0_190 = arith.constant 0 : index
    %c145_191 = arith.constant 145 : index
    %146 = vector.load %arg7[%c0_190, %c145_191] : memref<4x512xf32, #tpu.memory_space<vmem>>, vector<4x256xf32>
    %c0_192 = arith.constant 0 : index
    %c129_193 = arith.constant 129 : index
    %147 = vector.load %arg7[%c0_192, %c129_193] : memref<4x512xf32, #tpu.memory_space<vmem>>, vector<4x256xf32>
    %148 = arith.select %8, %147, %146 : vector<4x256xi1>, vector<4x256xf32>
    %c32_194 = arith.constant 32 : index
    %c256_195 = arith.constant 256 : index
    %149 = vector.load %arg8[%c32_194, %c256_195] : memref<36x512xf32, #tpu.memory_space<vmem>>, vector<4x256xf32>
    tpu.vector_store %arg8[%c32_194, %c256_195], %148 {strides = array<i32>} : memref<36x512xf32, #tpu.memory_space<vmem>>, vector<4x256xf32>,
    %c0_196 = arith.constant 0 : index
    %c0_197 = arith.constant 0 : index
    %150 = vector.load %arg4[%c0_196, %c0_197] : memref<4x36xf32, #tpu.memory_space<vmem>>, vector<4x36xf32>
    %c0_198 = arith.constant 0 : index
    %c0_199 = arith.constant 0 : index
    %151 = vector.load %arg8[%c0_198, %c0_199] : memref<36x512xf32, #tpu.memory_space<vmem>>, vector<36x512xf32>
    %cst_200 = arith.constant dense<0.000000e+00> : vector<4x512xf32>
    %152 = tpu.matmul %150, %151, %cst_200 {dimension_numbers = #tpu.dot_dimension_numbers<[1], [0], [0], [1], [0, 0, 1, 1], [], []>} : vector<4x36xf32>, vector<36x512xf32>, vector<4x512xf32> -> vector<4x512xf32>
    %c0_201 = arith.constant 0 : index
    %c0_202 = arith.constant 0 : index
    %153 = vector.load %arg5[%c0_201, %c0_202] : memref<4x1xf32, #tpu.memory_space<vmem>>, vector<4x1xf32>
    %154 = vector.broadcast %153 : vector<4x1xf32> to vector<4x512xf32>
    %155 = arith.addf %152, %154 : vector<4x512xf32>
    %cst_203 = arith.constant 0.000000e+00 : f32
    %156 = vector.broadcast %cst_203 : f32 to vector<4x512xf32>
    %157 = arith.cmpf oge, %155, %156 : vector<4x512xf32>
    %cst_204 = arith.constant 0.00999999977 : f32
    %158 = vector.broadcast %cst_204 : f32 to vector<4x512xf32>
    %159 = arith.mulf %158, %155 : vector<4x512xf32>
    %160 = arith.select %157, %155, %159 : vector<4x512xi1>, vector<4x512xf32>
    %161 = vector.extract_strided_slice %160 {offsets = [0, 0], sizes = [4, 256], strides = [1, 1]} : vector<4x512xf32> to vector<4x256xf32>
    %162 = arith.addf %10, %161 : vector<4x256xf32>
    %c0_205 = arith.constant 0 : index
    %c0_206 = arith.constant 0 : index
    %c0_207 = arith.constant 0 : index
    %163 = vector.load %arg6[%c0_205, %c0_206, %c0_207] : memref<2x4x256xf32, #tpu.memory_space<vmem>>, vector<1x4x256xf32>
    %164 = vector.shape_cast %163 : vector<1x4x256xf32> to vector<4x256xf32>
    %165 = vector.shape_cast %162 : vector<4x256xf32> to vector<1x4x256xf32>
    tpu.vector_store %arg6[%c0_205, %c0_206, %c0_207], %165 {strides = array<i32>} : memref<2x4x256xf32, #tpu.memory_space<vmem>>, vector<1x4x256xf32>,
    %166 = vector.extract_strided_slice %160 {offsets = [0, 256], sizes = [4, 256], strides = [1, 1]} : vector<4x512xf32> to vector<4x256xf32>
    %167 = arith.addf %12, %166 : vector<4x256xf32>
    %c1_208 = arith.constant 1 : index
    %c0_209 = arith.constant 0 : index
    %c0_210 = arith.constant 0 : index
    %168 = vector.load %arg6[%c1_208, %c0_209, %c0_210] : memref<2x4x256xf32, #tpu.memory_space<vmem>>, vector<1x4x256xf32>
    %169 = vector.shape_cast %168 : vector<1x4x256xf32> to vector<4x256xf32>
    %170 = vector.shape_cast %167 : vector<4x256xf32> to vector<1x4x256xf32>
    tpu.vector_store %arg6[%c1_208, %c0_209, %c0_210], %170 {strides = array<i32>} : memref<2x4x256xf32, #tpu.memory_space<vmem>>, vector<1x4x256xf32>,
    return
  }
  func.func @transform_0(%arg0: i32) -> (i32, i32, i32) {
    %c0_i32 = arith.constant 0 : i32
    %c0_i32_0 = arith.constant 0 : i32
    %c0_i32_1 = arith.constant 0 : i32
    return %arg0, %c0_i32, %c0_i32_0 : i32, i32, i32
  }
  func.func @transform_1(%arg0: i32) -> (i32, i32) {
    %c0_i32 = arith.constant 0 : i32
    %c0_i32_0 = arith.constant 0 : i32
    %c0_i32_1 = arith.constant 0 : i32
    return %c0_i32, %c0_i32_0 : i32, i32
  }
  func.func @transform_2(%arg0: i32) -> (i32, i32) {
    %c0_i32 = arith.constant 0 : i32
    %c0_i32_0 = arith.constant 0 : i32
    %c0_i32_1 = arith.constant 0 : i32
    return %c0_i32, %c0_i32_0 : i32, i32
  }
  func.func @transform_3(%arg0: i32) -> (i32, i32) {
    %c0_i32 = arith.constant 0 : i32
    %c0_i32_0 = arith.constant 0 : i32
    %c0_i32_1 = arith.constant 0 : i32
    return %c0_i32, %c0_i32_0 : i32, i32
  }
  func.func @transform_4(%arg0: i32) -> (i32, i32) {
    %c0_i32 = arith.constant 0 : i32
    %c0_i32_0 = arith.constant 0 : i32
    %c0_i32_1 = arith.constant 0 : i32
    return %c0_i32, %c0_i32_0 : i32, i32
  }
  func.func @transform_5(%arg0: i32) -> (i32, i32, i32) {
    %c0_i32 = arith.constant 0 : i32
    %c0_i32_0 = arith.constant 0 : i32
    %c0_i32_1 = arith.constant 0 : i32
    return %arg0, %c0_i32, %c0_i32_0 : i32, i32, i32
  }
}

</mosaic_0001>

<bundles_post_ra>
// kernel: tpu_custom_call.1
= control target key start
LH: loop header
LB: loop body
LE: loop exit
PB: predicated region body
PF: predicated region fallthrough
CT: control target
= control target key end

     0   :  { %10 = vsyncpa [#allocation5], 0  ;;  %s2413_s0 = inlined_call_operand.hbm [shape: f32[2,4,256], index: 0, kind: input, shape index: {}]   ;;  %s2414_s1 = inlined_call_operand.vmem [shape: f32[4,36], index: 1, kind: input, shape index: {}]   ;;  %s2415_s2 = inlined_call_operand.vmem [shape: f32[4,1], index: 2, kind: input, shape index: {}]   ;;  %s2416_s3 = inlined_call_operand.vmem [shape: f32[4,36], index: 3, kind: input, shape index: {}]   ;;  %s2417_s4 = inlined_call_operand.vmem [shape: f32[4,1], index: 4, kind: input, shape index: {}]   ;;  %s2418_s5 = inlined_call_operand.hbm [shape: f32[2,4,256], index: 5, kind: output, shape index: {}]  }
   0x1   :  { %11 = vsyncpa [#allocation6], 0  ;;  %s16_s20 = sshll.u32 %s2413_s0, 4  ;;  %s1725_s21 = smov [#allocation4]   ;;  %s17_s20 = int_to_ptr.hbm [resolvable:$true] %s16_s20 }
   0x2   :  { %s18_s22 = sshll.u32 %s1725_s21, 4  ;;  %s1726_s23 = smov 128   ;;  %s19_s22 = int_to_ptr.vmem [resolvable:$true] %s18_s22 }
   0x3   :  { %s1727_s24 = smov 8  }
   0x4   :  { %24 = dma.hbm_to_vmem [thread:$0]  %s17_s20, 256, %s19_s22, [#allocation5], %s1726_s23, %s1726_s23, %s1727_s24  }
   0x5   :  { %1721 = dma.done.wait [#allocation5], 256  }
   0x6   :  { %1722 = vsyncadd [#allocation5], 4294967040  ;;  %v1728_v0 = vmov 0.0   ;;  %v1777_v1 = vld [vmem:[#allocation4] sm:$0xff]  ;;  %s1729_s0 = smov 1   ;;  %s1730_s25 = smov 17   ;;  %v39_v59 = vlaneseq }
   0x7   :  { %37 = vst [vmem:[#allocation2] sm:$0xff] %v1728_v0  ;;  %s1731_s26 = smov 16   ;;  %v1798_v16 = vld [vmem:[#allocation4 + $0x8] sm:$0xff]  ;;  %s1732_s27 = smov 31   ;;  %vm68_vm0 = vcmask 7168   ;;  %vm85_vm1 = vcmask 138240  }
   0x8   :  { %38 = vst [vmem:[#allocation2 + $0x8] sm:$0xff] %v1728_v0  ;;  %s1733_s28 = smov 15   ;;  %s1734_s29 = smov 113   ;;  %v1842_v61 = vand.u32 127, %v39_v59  ;;  %vm111_vm3 = vcmask 130048   ;;  %vm134_vm4 = vcmask 252928  }
   0x9   :  { %51 = vst [vmem:[#allocation2 + $0x4] sm:$0xff] %v1777_v1  ;;  %s1735_s30 = smov 127   ;;  %s1736_s6 = smov 97   ;;  %vm151_vm5 = vcmask 121856   ;;  %vm178_vm8 = vcmask 924672   ;;  %vm256_vm10 = vcmask 1039360  }
   0xa   :  { %s1737_s7 = smov 112   ;;  %s1738_s8 = smov 111   ;;  %vm287_vm11 = vcmask 793600   ;;  %vm2420_vm12 = vcmask 916480   ;;  %vm2419_vm13 = vcmask 908288   ;;  %vm724_vm14 = vcmask 1043456  }
   0xb   :  { %vm720_vm15 = vcmask 293888   ;;  %s1626_s17 = sshll.u32 %s2418_s5, 4  ;;  %s1627_s17 = int_to_ptr.hbm [resolvable:$true] %s1626_s17 }
   0xf   :  { %v163_v21 = vld [vmem:[#allocation2 + $0xc] sm:$0xf] }
  0x10   :  { %v1780_v2 = vld [vmem:[#allocation2] sm:$0xff]  ;;  %v53_v3 = vld [vmem:[#allocation2 + $0x8] sm:$0xf]  ;;  %v221_v31 = vld [vmem:[#allocation2 + $0xc] sm:$0xf] }
  0x11   :  { %56 = vst [vmem:[#allocation1] ss:$2 sm:$0xff] %v1780_v2  ;;  %v95_v7 = vld [vmem:[#allocation2 + $0x8] sm:$0xf]  ;;  %v272_v37 = vld [vmem:[#allocation2 + $0xc] sm:$0xf] }
  0x12   :  { %58 = vst [vmem:[#allocation1 + $0x10] ss:$2 sm:$0xff] %v53_v3  ;;  %v119_v11 = vld [vmem:[#allocation2 + $0x8] sm:$0xf]  ;;  %v313_v44 = vld [vmem:[#allocation2 + $0xc] sm:$0xf] }
  0x13   :  { %v161_v14 = vld [vmem:[#allocation2 + $0x8] sm:$0xf]  ;;  %v337_v48 = vld [vmem:[#allocation2 + $0xc] sm:$0xf] }
  0x14   :  { %v223_v17 = vld [vmem:[#allocation2 + $0x8] sm:$0xf] }
  0x15   :  { %377 = vst [vmem:[#allocation2 + $0x4] sm:$0xff] %v1798_v16 }
  0x18   :  { %v60_v4 = vld.sshfl [vmem:[#allocation1 + $0x8] sm:$0xff pattern:$0x75316420]  ;;  %v1783_v5 = vld.sshfl [vmem:[#allocation1] sm:$0xff pattern:$0x75316420] }
  0x19   :  { %64 = vrot.lane.b32.xlu1 %v60_v4, %s1729_s0  ;;  %73 = vst [vmem:[#allocation1] ss:$2 sm:$0xff] %v1780_v2  ;;  %v61_v6 = vld.sshfl [vmem:[#allocation1 + $0x10] sm:$0xff pattern:$0x75316420] }
  0x1a   :  { %66 = vrot.lane.b32.xlu2 %v61_v6, %s1729_s0  ;;  %75 = vst [vmem:[#allocation1 + $0x10] ss:$2 sm:$0xff] %v53_v3 }
  0x1c   :  { %v379_v56 = vld [vmem:[#allocation2 + $0x8] sm:$0xf]  ;;  %v1840_v60 = vld [vmem:[#allocation2] sm:$0xff] }
  0x20   :  { %v1788_v8 = vld.sshfl [vmem:[#allocation1] sm:$0xff pattern:$0x75316420]  ;;  %v77_v9 = vld.sshfl [vmem:[#allocation1 + $0x8] sm:$0xff pattern:$0x75316420] }
  0x21   :  { %v78_v10 = vld.sshfl [vmem:[#allocation1 + $0x10] sm:$0xff pattern:$0x75316420]  ;;  %99 = vst [vmem:[#allocation1 + $0x1] ss:$2 sm:$0xff] %v1780_v2  ;;  %81 = vrot.lane.b32.xlu0 %v77_v9, %s1730_s25 }
  0x22   :  { %83 = vrot.lane.b32.xlu1 %v78_v10, %s1730_s25  ;;  %101 = vst [vmem:[#allocation1 + $0x11] ss:$2 sm:$0xff] %v95_v7  ;;  %v419_v10 = vld [vmem:[#allocation2 + $0x8] sm:$0xf] }
  0x28   :  { %v103_v12 = vld.sshfl [vmem:[#allocation1 + $0x8] sm:$0xff pattern:$0x75316420]  ;;  %v1793_v13 = vld.sshfl [vmem:[#allocation1] sm:$0xff pattern:$0x75316420] }
  0x29   :  { %v104_v15 = vld.sshfl [vmem:[#allocation1 + $0x10] sm:$0xff pattern:$0x75316420]  ;;  %122 = vst [vmem:[#allocation1] ss:$2 sm:$0xff] %v1780_v2 }
  0x2a   :  { %109 = vrot.lane.b32.xlu2 %v104_v15, %s1731_s26  ;;  %107 = vrot.lane.b32.xlu1 %v103_v12, %s1731_s26  ;;  %124 = vst [vmem:[#allocation1 + $0x10] ss:$2 sm:$0xff] %v119_v11  ;;  %v1471_v12 = vld [vmem:[%s2416_s3] sm:$0xf] }
  0x30   :  { %v126_v18 = vld.sshfl [vmem:[#allocation1 + $0x8] sm:$0xff pattern:$0x75316420]  ;;  %v125_v19 = vld.sshfl [vmem:[#allocation1] sm:$0xff pattern:$0x75316420] }
  0x31   :  { %v127_v20 = vld.sshfl [vmem:[#allocation1 + $0x10] sm:$0xff pattern:$0x75316420]  ;;  %139 = vst [vmem:[#allocation1] ss:$2 sm:$0xff] %v1780_v2 }
  0x32   :  { %132 = vrot.lane.b32.xlu2 %v127_v20, %s1732_s27  ;;  %141 = vst [vmem:[#allocation1 + $0x10] ss:$2 sm:$0xff] %v119_v11  ;;  %130 = vrot.lane.b32.xlu1 %v126_v18, %s1732_s27 }
  0x38   :  { %v143_v22 = vld.sshfl [vmem:[#allocation1 + $0x8] sm:$0xff pattern:$0x75316420]  ;;  %v142_v23 = vld.sshfl [vmem:[#allocation1] sm:$0xff pattern:$0x75316420] }
  0x39   :  { %v144_v24 = vld.sshfl [vmem:[#allocation1 + $0x10] sm:$0xff pattern:$0x75316420]  ;;  %147 = vrot.lane.b32.xlu0 %v143_v22, %s1733_s28  ;;  %166 = vst [vmem:[#allocation1] ss:$2 sm:$0xff] %v1777_v1 }
  0x3a   :  { %149 = vrot.lane.b32.xlu1 %v144_v24, %s1733_s28  ;;  %128 = vrot.lane.b32.xlu2 %v125_v19, %s1732_s27  ;;  %168 = vst [vmem:[#allocation1 + $0x10] ss:$2 sm:$0xff] %v163_v21  ;;  %v442_v22 = vld [vmem:[#allocation2 + $0x8] sm:$0xf] }
  0x40   :  { %v170_v25 = vld.sshfl [vmem:[#allocation1 + $0x8] sm:$0xff pattern:$0x75316420]  ;;  %v169_v26 = vld.sshfl [vmem:[#allocation1] sm:$0xff pattern:$0x75316420] }
  0x41   :  { %v171_v27 = vld.sshfl [vmem:[#allocation1 + $0x10] sm:$0xff pattern:$0x75316420]  ;;  %145 = vrot.lane.b32.xlu0 %v142_v23, %s1733_s28  ;;  %185 = vst [vmem:[#allocation1] ss:$2 sm:$0xff] %v1780_v2 }
  0x42   :  { %176 = vrot.lane.b32.xlu2 %v171_v27, %s1734_s29  ;;  %174 = vrot.lane.b32.xlu1 %v170_v25, %s1734_s29  ;;  %187 = vst [vmem:[#allocation1 + $0x10] ss:$2 sm:$0xff] %v161_v14 }
  0x48   :  { %v189_v28 = vld.sshfl [vmem:[#allocation1 + $0x8] sm:$0xff pattern:$0x75316420]  ;;  %v188_v29 = vld.sshfl [vmem:[#allocation1] sm:$0xff pattern:$0x75316420] }
  0x49   :  { %v190_v30 = vld.sshfl [vmem:[#allocation1 + $0x10] sm:$0xff pattern:$0x75316420]  ;;  %193 = vrot.lane.b32.xlu0 %v189_v28, %s1729_s0  ;;  %213 = vst [vmem:[#allocation1] ss:$2 sm:$0xff] %v1777_v1 }
  0x4a   :  { %195 = vrot.lane.b32.xlu1 %v190_v30, %s1729_s0  ;;  %172 = vrot.lane.b32.xlu2 %v169_v26, %s1734_s29  ;;  %228 = vst [vmem:[#allocation1 + $0x10] ss:$2 sm:$0xff] %v223_v17 }
  0x50   :  { %v214_v32 = vld.sshfl [vmem:[#allocation1] sm:$0xff pattern:$0x75316420]  ;;  %v215_v33 = vld.sshfl [vmem:[#allocation1 + $0x8] sm:$0xff pattern:$0x75316420] }
  0x51   :  { %v231_v34 = vld.sshfl [vmem:[#allocation1 + $0x10] sm:$0xff pattern:$0x75316420]  ;;  %191 = vrot.lane.b32.xlu0 %v188_v29, %s1729_s0  ;;  %226 = vst [vmem:[#allocation1] ss:$2 sm:$0xff] %v1780_v2  ;;  %v41_v2 = vadd.s32 128, %v1842_v61 }
  0x52   :  { %236 = vrot.lane.b32.xlu2 %v231_v34, %s1733_s28  ;;  %218 = vst [vmem:[#allocation3 + $0x60] sm:$0xf] %v214_v32 }
  0x53   :  { %219 = vst [vmem:[#allocation3 + $0x38] sm:$0xf] %v215_v33  ;;  %v43_v6 = vand.u32 15, %v41_v2  ;;  %v484_v33 = vld [vmem:[#allocation2 + $0xc] sm:$0xf] }
  0x54   :  { %246 = vst [vmem:[#allocation1 + $0x10] ss:$2 sm:$0xff] %v221_v31 }
  0x55   :  { %vm1859_vm2 = vcmp.lt.s32.totalorder %v43_v6, 1  ;;  %vm1894_vm6 = vcmp.ge.s32.totalorder %v43_v6, 15  ;;  %v541_v6 = vld [vmem:[#allocation2 + $0xc] sm:$0xf] }
  0x58   :  { %v230_v35 = vld.sshfl [vmem:[#allocation1 + $0x8] sm:$0xff pattern:$0x75316420]  ;;  %v229_v36 = vld.sshfl [vmem:[#allocation1] sm:$0xff pattern:$0x75316420] }
  0x59   :  { %244 = vst [vmem:[#allocation1] ss:$2 sm:$0xff] %v1777_v1 }
  0x5a   :  { %234 = vrot.lane.b32.xlu2 %v230_v35, %s1733_s28 }
  0x5b   :  { %v249_v38 = vld.sshfl [vmem:[#allocation1 + $0x10] sm:$0xff pattern:$0x75316420] }
  0x5c   :  { %254 = vrot.lane.b32.xlu1 %v249_v38, %s1735_s30  ;;  %277 = vst [vmem:[#allocation1 + $0x10] ss:$2 sm:$0xff] %v272_v37 }
  0x60   :  { %v248_v39 = vld.sshfl [vmem:[#allocation1 + $0x8] sm:$0xff pattern:$0x75316420]  ;;  %v247_v40 = vld.sshfl [vmem:[#allocation1] sm:$0xff pattern:$0x75316420] }
  0x61   :  { %252 = vrot.lane.b32.xlu0 %v248_v39, %s1735_s30  ;;  %275 = vst [vmem:[#allocation1] ss:$2 sm:$0xff] %v1777_v1 }
  0x62   :  { %232 = vrot.lane.b32.xlu2 %v229_v36, %s1733_s28 }
  0x63   :  { %v280_v41 = vld.sshfl [vmem:[#allocation1 + $0x10] sm:$0xff pattern:$0x75316420] }
  0x64   :  { %294 = vst [vmem:[#allocation1 + $0x10] ss:$2 sm:$0xff] %v272_v37 }
  0x68   :  { %v279_v42 = vld.sshfl [vmem:[#allocation1 + $0x8] sm:$0xff pattern:$0x75316420]  ;;  %v278_v43 = vld.sshfl [vmem:[#allocation1] sm:$0xff pattern:$0x75316420] }
  0x69   :  { %285 = vrot.lane.b32.xlu0 %v280_v41, %s1736_s6  ;;  %281 = vrot.lane.b32.xlu1 %v278_v43, %s1736_s6  ;;  %292 = vst [vmem:[#allocation1] ss:$2 sm:$0xff] %v1777_v1  ;;  %v42_v41 = vand.u32 15, %v1842_v61 }
  0x6a   :  { %283 = vrot.lane.b32.xlu2 %v279_v42, %s1736_s6 }
  0x6b   :  { %v297_v45 = vld.sshfl [vmem:[#allocation1 + $0x10] sm:$0xff pattern:$0x75316420]  ;;  %vm1909_vm7 = vcmp.ge.s32.totalorder %v42_v41, 15  ;;  %vm1934_vm9 = vcmp.lt.s32.totalorder %v42_v41, 1 }
  0x6c   :  { %319 = vst [vmem:[#allocation1 + $0x11] ss:$2 sm:$0xff] %v313_v44  ;;  %v482_v44 = vld [vmem:[#allocation2 + $0x8] sm:$0xf] }
  0x70   :  { %v296_v46 = vld.sshfl [vmem:[#allocation1 + $0x8] sm:$0xff pattern:$0x75316420]  ;;  %v295_v47 = vld.sshfl [vmem:[#allocation1] sm:$0xff pattern:$0x75316420] }
  0x71   :  { %250 = vrot.lane.b32.xlu0 %v247_v40, %s1735_s30  ;;  %300 = vrot.lane.b32.xlu1 %v296_v46, %s1734_s29  ;;  %317 = vst [vmem:[#allocation1 + $0x1] ss:$2 sm:$0xff] %v1777_v1 }
  0x72   :  { %302 = vrot.lane.b32.xlu2 %v297_v45, %s1734_s29 }
  0x73   :  { %v322_v49 = vld.sshfl [vmem:[#allocation1 + $0x10] sm:$0xff pattern:$0x75316420] }
  0x74   :  { %342 = vst [vmem:[#allocation1 + $0x10] ss:$2 sm:$0xff] %v337_v48  ;;  %v67_v52 = vpop.permute.xlu2 %66 }
  0x78   :  { %v321_v50 = vld.sshfl [vmem:[#allocation1 + $0x8] sm:$0xff pattern:$0x75316420]  ;;  %v320_v51 = vld.sshfl [vmem:[#allocation1] sm:$0xff pattern:$0x75316420] }
  0x79   :  { %327 = vrot.lane.b32.xlu0 %v322_v49, %s1737_s7  ;;  %340 = vst [vmem:[#allocation1] ss:$2 sm:$0xff] %v1777_v1 }
  0x7a   :  { %298 = vrot.lane.b32.xlu2 %v295_v47, %s1734_s29 }
  0x7b   :  { %v345_v53 = vld.sshfl [vmem:[#allocation1 + $0x10] sm:$0xff pattern:$0x75316420] }
  0x7c   :  { %358 = vst [vmem:[#allocation1 + $0x10] ss:$2 sm:$0xff] %v337_v48 }
  0x80   :  { %v343_v54 = vld.sshfl [vmem:[#allocation1] sm:$0xff pattern:$0x75316420]  ;;  %v344_v55 = vld.sshfl [vmem:[#allocation1 + $0x8] sm:$0xff pattern:$0x75316420] }
  0x81   :  { %350 = vrot.lane.b32.xlu0 %v345_v53, %s1735_s30  ;;  %356 = vst [vmem:[#allocation1] ss:$2 sm:$0xff] %v1777_v1 }
  0x82   :  { %325 = vrot.lane.b32.xlu2 %v321_v50, %s1737_s7 }
  0x83   :  { %v361_v57 = vld.sshfl [vmem:[#allocation1 + $0x10] sm:$0xff pattern:$0x75316420] }
  0x84   :  { %366 = vrot.lane.b32.xlu1 %v361_v57, %s1738_s8  ;;  %v110_v58 = vpop.permute.xlu2 %109  ;;  %384 = vst [vmem:[#allocation1 + $0x10] ss:$2 sm:$0xff] %v379_v56 }
  0x88   :  { %v360_v62 = vld.sshfl [vmem:[#allocation1 + $0x8] sm:$0xff pattern:$0x75316420]  ;;  %v359_v63 = vld.sshfl [vmem:[#allocation1] sm:$0xff pattern:$0x75316420] }
  0x89   :  { %323 = vrot.lane.b32.xlu0 %v320_v51, %s1737_s7  ;;  %382 = vst [vmem:[#allocation1] ss:$2 sm:$0xff] %v1840_v60 }
  0x8a   :  { %105 = vrot.lane.b32.xlu2 %v1793_v13, %s1731_s26 }
  0x8b   :  { %v1848_v0 = vpop.permute.xlu1 %64  ;;  %v387_v3 = vld.sshfl [vmem:[#allocation1 + $0x10] sm:$0xff pattern:$0x75316420] }
  0x8c   :  { %364 = vrot.lane.b32.xlu1 %v360_v62, %s1738_s8  ;;  %v133_v4 = vpop.permute.xlu2 %132  ;;  %400 = vst [vmem:[#allocation1 + $0x10] ss:$2 sm:$0xff] %v379_v56  ;;  %v70_v11 = vsel %vm68_vm0, %v1848_v0, %v67_v52 }
  0x90   :  { %v386_v7 = vld.sshfl [vmem:[#allocation1 + $0x8] sm:$0xff pattern:$0x75316420]  ;;  %v1852_v9 = vld.sshfl [vmem:[#allocation1] sm:$0xff pattern:$0x75316420] }
  0x91   :  { %348 = vrot.lane.b32.xlu0 %v344_v55, %s1735_s30  ;;  %398 = vst [vmem:[#allocation1] ss:$2 sm:$0xff] %v1840_v60  ;;  %v543_v55 = vld [vmem:[#allocation2 + $0x8] sm:$0xf] }
  0x92   :  { %392 = vrot.lane.b32.xlu2 %v387_v3, %s1729_s0 }
  0x93   :  { %v1863_v13 = vpop.permute.xlu0 %81  ;;  %v403_v14 = vld.sshfl [vmem:[#allocation1 + $0x10] sm:$0xff pattern:$0x75316420] }
  0x94   :  { %362 = vrot.lane.b32.xlu1 %v359_v63, %s1738_s8  ;;  %v84_v15 = vpop.permute.xlu1 %83  ;;  %v129_v17 = vpop.permute.xlu2 %128  ;;  %425 = vst [vmem:[#allocation1 + $0x11] ss:$2 sm:$0xff] %v419_v10 }
  0x95   :  { %v87_v18 = vsel %vm85_vm1, %v1863_v13, %v84_v15 }
  0x96   :  { %v91_v19 = vsel %vm1859_vm2, %v70_v11, %v87_v18 }
  0x97   :  { %93 = vst [vmem:[#allocation3 + $0x68] sm:$0xf] %v91_v19 }
  0x98   :  { %v402_v20 = vld.sshfl [vmem:[#allocation1 + $0x8] sm:$0xff pattern:$0x75316420]  ;;  %v1870_v21 = vld.sshfl [vmem:[#allocation1] sm:$0xff pattern:$0x75316420] }
  0x99   :  { %346 = vrot.lane.b32.xlu0 %v343_v54, %s1735_s30  ;;  %423 = vst [vmem:[#allocation1 + $0x1] ss:$2 sm:$0xff] %v1840_v60 }
  0x9b   :  { %v1874_v23 = vld.sshfl [vmem:[#allocation1 + $0x10] sm:$0xff pattern:$0x75316420] }
  0x9c   :  { %79 = vrot.lane.b32.xlu1 %v1788_v8, %s1730_s25  ;;  %v1878_v24 = vpop.permute.xlu1 %107  ;;  %v177_v25 = vpop.permute.xlu2 %176  ;;  %447 = vst [vmem:[#allocation1 + $0x10] ss:$2 sm:$0xff] %v442_v22 }
  0x9d   :  { %v113_v26 = vsel %vm111_vm3, %v1878_v24, %v110_v58 }
  0x9e   :  { %117 = vst [vmem:[#allocation3 + $0x68] sm:$0xf0] %v113_v26 }
  0xa0   :  { %v427_v27 = vld.sshfl [vmem:[#allocation1 + $0x8] sm:$0xff pattern:$0x75316420]  ;;  %v1882_v28 = vld.sshfl [vmem:[#allocation1] sm:$0xff pattern:$0x75316420] }
  0xa1   :  { %62 = vrot.lane.b32.xlu0 %v1783_v5, %s1729_s0  ;;  %445 = vst [vmem:[#allocation1] ss:$2 sm:$0xff] %v1840_v60 }
  0xa3   :  { %v450_v29 = vld.sshfl [vmem:[#allocation1 + $0x10] sm:$0xff pattern:$0x75316420] }
  0xa4   :  { %390 = vrot.lane.b32.xlu1 %v386_v7, %s1729_s0  ;;  %v131_v8 = vpop.permute.xlu1 %130  ;;  %v1888_v30 = vpop.permute.xlu2 %172  ;;  %455 = vrot.lane.b32.xlu2 %v450_v29, %s1732_s27  ;;  %463 = vst [vmem:[#allocation1 + $0x10] ss:$2 sm:$0xff] %v442_v22 }
  0xa5   :  { %v136_v5 = vsel %vm134_vm4, %v131_v8, %v133_v4  ;;  %v135_v45 = vsel %vm134_vm4, %v129_v17, %v131_v8 }
  0xa8   :  { %v448_v31 = vld.sshfl [vmem:[#allocation1] sm:$0xff pattern:$0x75316420]  ;;  %v449_v32 = vld.sshfl [vmem:[#allocation1 + $0x8] sm:$0xff pattern:$0x75316420] }
  0xa9   :  { %406 = vrot.lane.b32.xlu0 %v402_v20, %s1730_s25  ;;  %461 = vst [vmem:[#allocation1] ss:$2 sm:$0xff] %v1840_v60  ;;  %v591_v20 = vld [vmem:[#allocation2 + $0xc] sm:$0xf] }
  0xab   :  { %v148_v35 = vpop.permute.xlu0 %147  ;;  %v466_v36 = vld.sshfl [vmem:[#allocation1 + $0x10] sm:$0xff pattern:$0x75316420] }
  0xac   :  { %408 = vrot.lane.b32.xlu1 %v403_v14, %s1730_s25  ;;  %v150_v37 = vpop.permute.xlu1 %149  ;;  %v1899_v38 = vpop.permute.xlu2 %236  ;;  %451 = vrot.lane.b32.xlu2 %v448_v31, %s1732_s27  ;;  %489 = vst [vmem:[#allocation1 + $0x10] ss:$2 sm:$0xff] %v484_v33 }
  0xad   :  { %v153_v39 = vsel %vm151_vm5, %v148_v35, %v150_v37  ;;  %v631_v37 = vld [vmem:[#allocation2 + $0xc] sm:$0xf] }
  0xae   :  { %v157_v40 = vsel %vm1894_vm6, %v136_v5, %v153_v39 }
  0xaf   :  { %159 = vst [vmem:[#allocation3 + $0x28] sm:$0xf] %v157_v40 }
  0xb0   :  { %v465_v42 = vld.sshfl [vmem:[#allocation1 + $0x8] sm:$0xff pattern:$0x75316420]  ;;  %v464_v43 = vld.sshfl [vmem:[#allocation1] sm:$0xff pattern:$0x75316420] }
  0xb1   :  { %469 = vrot.lane.b32.xlu0 %v465_v42, %s1733_s28  ;;  %487 = vst [vmem:[#allocation1] ss:$2 sm:$0xff] %v1798_v16 }
  0xb3   :  { %v146_v47 = vpop.permute.xlu0 %145  ;;  %v492_v48 = vld.sshfl [vmem:[#allocation1 + $0x10] sm:$0xff pattern:$0x75316420] }
  0xb4   :  { %431 = vrot.lane.b32.xlu1 %v427_v27, %s1731_s26  ;;  %v152_v49 = vsel %vm151_vm5, %v146_v47, %v148_v35  ;;  %v175_v50 = vpop.permute.xlu1 %174  ;;  %v1915_v51 = vpop.permute.xlu2 %234  ;;  %497 = vrot.lane.b32.xlu2 %v492_v48, %s1734_s29  ;;  %507 = vst [vmem:[#allocation1 + $0x10] ss:$2 sm:$0xff] %v482_v44  ;;  %v654_v44 = vld [vmem:[#allocation2 + $0xc] sm:$0xf] }
  0xb5   :  { %v156_v52 = vsel %vm1909_vm7, %v135_v45, %v152_v49  ;;  %v180_v56 = vsel %vm178_vm8, %v175_v50, %v177_v25  ;;  %v179_v7 = vsel %vm178_vm8, %v1888_v30, %v175_v50  ;;  %v239_v31 = vsel %vm151_vm5, %v1915_v51, %v1899_v38 }
  0xb6   :  { %158 = vst [vmem:[#allocation3 + $0x10] sm:$0xf] %v156_v52 }
  0xb8   :  { %v490_v53 = vld.sshfl [vmem:[#allocation1] sm:$0xff pattern:$0x75316420]  ;;  %v491_v54 = vld.sshfl [vmem:[#allocation1 + $0x8] sm:$0xff pattern:$0x75316420] }
  0xb9   :  { %467 = vrot.lane.b32.xlu0 %v464_v43, %s1733_s28  ;;  %505 = vst [vmem:[#allocation1] ss:$2 sm:$0xff] %v1840_v60 }
  0xbb   :  { %v194_v57 = vpop.permute.xlu0 %193  ;;  %v510_v58 = vld.sshfl [vmem:[#allocation1 + $0x10] sm:$0xff pattern:$0x75316420] }
  0xbc   :  { %453 = vrot.lane.b32.xlu1 %v449_v32, %s1732_s27  ;;  %v196_v59 = vpop.permute.xlu1 %195  ;;  %v1924_v61 = vpop.permute.xlu2 %232  ;;  %493 = vrot.lane.b32.xlu2 %v490_v53, %s1734_s29  ;;  %548 = vst [vmem:[#allocation1 + $0x10] ss:$2 sm:$0xff] %v543_v55 }
  0xbd   :  { %v198_v62 = vsel %vm68_vm0, %v194_v57, %v196_v59  ;;  %v238_v48 = vsel %vm151_vm5, %v1924_v61, %v1915_v51 }
  0xbe   :  { %v202_v63 = vsel %vm1859_vm2, %v180_v56, %v198_v62 }
  0xbf   :  { %v206_v2 = vrot.slane %v202_v63, 4 }
  0xc0   :  { %v509_v3 = vld.sshfl [vmem:[#allocation1 + $0x8] sm:$0xff pattern:$0x75316420]  ;;  %v508_v4 = vld.sshfl [vmem:[#allocation1] sm:$0xff pattern:$0x75316420] }
  0xc1   :  { %210 = vst [vmem:[#allocation3 + $0x28] sm:$0xf0] %v206_v2  ;;  %513 = vrot.lane.b32.xlu0 %v509_v3, %s1729_s0 }
  0xc2   :  { %533 = vst [vmem:[#allocation1] ss:$2 sm:$0xff] %v1798_v16 }
  0xc3   :  { %v192_v11 = vpop.permute.xlu0 %191  ;;  %v551_v14 = vld.sshfl [vmem:[#allocation1 + $0x10] sm:$0xff pattern:$0x75316420] }
  0xc4   :  { %471 = vrot.lane.b32.xlu1 %v466_v36, %s1733_s28  ;;  %v197_v15 = vsel %vm68_vm0, %v192_v11, %v194_v57  ;;  %v284_v17 = vpop.permute.xlu2 %283  ;;  %556 = vrot.lane.b32.xlu2 %v551_v14, %s1733_s28  ;;  %566 = vst [vmem:[#allocation1 + $0x10] ss:$2 sm:$0xff] %v541_v6 }
  0xc5   :  { %v201_v18 = vsel %vm1934_vm9, %v179_v7, %v197_v15 }
  0xc6   :  { %v205_v19 = vrot.slane %v201_v18, 4 }
  0xc8   :  { %209 = vst [vmem:[#allocation3 + $0x10] sm:$0xf0] %v205_v19 }
  0xc9   :  { %511 = vrot.lane.b32.xlu0 %v508_v4, %s1729_s0  ;;  %v534_v22 = vld.sshfl [vmem:[#allocation1] sm:$0xff pattern:$0x75316420]  ;;  %v535_v25 = vld.sshfl [vmem:[#allocation1 + $0x8] sm:$0xff pattern:$0x75316420] }
  0xca   :  { %546 = vst [vmem:[#allocation1] ss:$2 sm:$0xff] %v1840_v60 }
  0xcb   :  { %v569_v26 = vld.sshfl [vmem:[#allocation1 + $0x10] sm:$0xff pattern:$0x75316420]  ;;  %538 = vst [vmem:[#allocation3 + $0x98] sm:$0xf] %v534_v22 }
  0xcc   :  { %495 = vrot.lane.b32.xlu1 %v491_v54, %s1734_s29  ;;  %v303_v27 = vpop.permute.xlu2 %302  ;;  %596 = vst [vmem:[#allocation1 + $0x10] ss:$2 sm:$0xff] %v591_v20 }
  0xcd   :  { %539 = vst [vmem:[#allocation3 + $0x30] sm:$0xf] %v535_v25 }
  0xce   :  { %v255_v29 = vpop.permute.xlu1 %254 }
  0xd1   :  { %v549_v8 = vld.sshfl [vmem:[#allocation1] sm:$0xff pattern:$0x75316420]  ;;  %v550_v30 = vld.sshfl [vmem:[#allocation1 + $0x8] sm:$0xff pattern:$0x75316420] }
  0xd2   :  { %552 = vrot.lane.b32.xlu2 %v549_v8, %s1733_s28  ;;  %564 = vst [vmem:[#allocation1] ss:$2 sm:$0xff] %v1798_v16 }
  0xd3   :  { %v599_v60 = vld.sshfl [vmem:[#allocation1 + $0x10] sm:$0xff pattern:$0x75316420]  ;;  %v253_v32 = vpop.permute.xlu0 %252 }
  0xd4   :  { %515 = vrot.lane.b32.xlu1 %v510_v58, %s1729_s0  ;;  %604 = vrot.lane.b32.xlu0 %v599_v60, %s1736_s6  ;;  %612 = vst [vmem:[#allocation1 + $0x10] ss:$2 sm:$0xff] %v591_v20  ;;  %v258_v33 = vsel %vm256_vm10, %v253_v32, %v255_v29  ;;  %v299_v5 = vpop.permute.xlu2 %298 }
  0xd5   :  { %v262_v35 = vsel %vm1894_vm6, %v239_v31, %v258_v33 }
  0xd6   :  { %v266_v36 = vrot.slane %v262_v35, 4  ;;  %v1739_v35 = vmov 0  }
  0xd7   :  { %1671 = vset.pattern.permute.xlu0 %v1739_v35  ;;  %1672 = vset.pattern.permute.xlu2 %v1739_v35 }
  0xd8   :  { %270 = vst [vmem:[#allocation3 + $0x38] sm:$0xf0] %v266_v36 }
  0xd9   :  { %v568_v38 = vld.sshfl [vmem:[#allocation1 + $0x8] sm:$0xff pattern:$0x75316420]  ;;  %v567_v39 = vld.sshfl [vmem:[#allocation1] sm:$0xff pattern:$0x75316420] }
  0xda   :  { %594 = vst [vmem:[#allocation1] ss:$2 sm:$0xff] %v1798_v16 }
  0xdb   :  { %v286_v40 = vpop.permute.xlu0 %285  ;;  %v282_v41 = vpop.permute.xlu1 %281  ;;  %v615_v42 = vld.sshfl [vmem:[#allocation1 + $0x10] sm:$0xff pattern:$0x75316420] }
  0xdc   :  { %574 = vrot.lane.b32.xlu1 %v569_v26, %s1735_s30  ;;  %572 = vrot.lane.b32.xlu0 %v568_v38, %s1735_s30  ;;  %v326_v43 = vpop.permute.xlu2 %325  ;;  %637 = vst [vmem:[#allocation1 + $0x11] ss:$2 sm:$0xff] %v631_v37  ;;  %v288_v49 = vsel %vm287_vm11, %v282_v41, %v284_v17  ;;  %v289_v50 = vsel %vm287_vm11, %v284_v17, %v286_v40 }
  0xdd   :  { %620 = vrot.lane.b32.xlu2 %v615_v42, %s1734_s29 }
  0xe1   :  { %v598_v45 = vld.sshfl [vmem:[#allocation1 + $0x8] sm:$0xff pattern:$0x75316420]  ;;  %v597_v47 = vld.sshfl [vmem:[#allocation1] sm:$0xff pattern:$0x75316420] }
  0xe2   :  { %610 = vst [vmem:[#allocation1] ss:$2 sm:$0xff] %v1798_v16 }
  0xe3   :  { %v251_v52 = vpop.permute.xlu0 %250  ;;  %v301_v53 = vpop.permute.xlu1 %300  ;;  %v640_v54 = vld.sshfl [vmem:[#allocation1 + $0x10] sm:$0xff pattern:$0x75316420] }
  0xe4   :  { %554 = vrot.lane.b32.xlu1 %v550_v30, %s1733_s28  ;;  %570 = vrot.lane.b32.xlu0 %v567_v39, %s1735_s30  ;;  %v257_v55 = vsel %vm256_vm10, %v251_v52, %v253_v32  ;;  %v304_v56 = vsel %vm178_vm8, %v299_v5, %v301_v53  ;;  %v305_v57 = vsel %vm178_vm8, %v301_v53, %v303_v27  ;;  %v106_v51 = vpop.permute.xlu2 %105  ;;  %v714_v53 = vld [vmem:[%s2415_s2] sm:$0xf] }
  0xe5   :  { %659 = vst [vmem:[#allocation1 + $0x10] ss:$2 sm:$0xff] %v654_v44  ;;  %v261_v58 = vsel %vm1909_vm7, %v238_v48, %v257_v55  ;;  %v308_v59 = vsel %vm1934_vm9, %v288_v49, %v304_v56  ;;  %v309_v61 = vsel %vm1859_vm2, %v289_v50, %v305_v57  ;;  %602 = vrot.lane.b32.xlu2 %v598_v45, %s1736_s6  ;;  %v2029_v48 = vld [vmem:[%s2414_s1] sm:$0xf]  ;;  %v698_v55 = vld [vmem:[#allocation3 + $0x10] sm:$0xff] }
  0xe6   :  { %v265_v62 = vrot.slane %v261_v58, 4  ;;  %310 = vst [vmem:[#allocation3 + $0x58] sm:$0xf] %v308_v59  ;;  %v112_v63 = vsel %vm111_vm3, %v106_v51, %v1878_v24  ;;  %v695_v50 = vld [vmem:[#allocation3 + $0x68] sm:$0xff] }
  0xe7   :  { %311 = vst [vmem:[#allocation3 + $0x70] sm:$0xf] %v309_v61 }
  0xe8   :  { %269 = vst [vmem:[#allocation3 + $0x60] sm:$0xf0] %v265_v62 }
  0xe9   :  { %116 = vst [vmem:[#allocation3] sm:$0xf0] %v112_v63  ;;  %v613_v2 = vld.sshfl [vmem:[#allocation1] sm:$0xff pattern:$0x75316420] }
  0xea   :  { %v614_v3 = vld.sshfl [vmem:[#allocation1 + $0x8] sm:$0xff pattern:$0x75316420] }
  0xeb   :  { %v328_v6 = vpop.permute.xlu0 %327  ;;  %635 = vst [vmem:[#allocation1 + $0x1] ss:$2 sm:$0xff] %v1798_v16 }
  0xec   :  { %v662_v4 = vld.sshfl [vmem:[#allocation1 + $0x10] sm:$0xff pattern:$0x75316420]  ;;  %645 = vrot.lane.b32.xlu0 %v640_v54, %s1737_s7  ;;  %600 = vrot.lane.b32.xlu1 %v597_v47, %s1736_s6  ;;  %v331_v7 = vsel %vm2420_vm12, %v326_v43, %v328_v6  ;;  %v1988_v17 = vpop.permute.xlu2 %392 }
  0xed   :  { %675 = vst [vmem:[#allocation1 + $0x10] ss:$2 sm:$0xff] %v654_v44  ;;  %616 = vrot.lane.b32.xlu2 %v613_v2, %s1734_s29  ;;  %v699_v44 = vld [vmem:[#allocation3 + $0x28] sm:$0xff] }
  0xee   :  { %335 = vst [vmem:[#allocation3 + $0x70] sm:$0xf0] %v331_v7 }
  0xf2   :  { %v639_v24 = vld.sshfl [vmem:[#allocation1 + $0x8] sm:$0xff pattern:$0x75316420]  ;;  %v638_v11 = vld.sshfl [vmem:[#allocation1] sm:$0xff pattern:$0x75316420] }
  0xf3   :  { %v351_v15 = vpop.permute.xlu0 %350  ;;  %657 = vst [vmem:[#allocation1] ss:$2 sm:$0xff] %v1798_v16 }
  0xf4   :  { %v678_v14 = vld.sshfl [vmem:[#allocation1 + $0x10] sm:$0xff pattern:$0x75316420]  ;;  %667 = vrot.lane.b32.xlu1 %v662_v4, %s1735_s30 }
  0xf5   :  { %683 = vrot.lane.b32.xlu0 %v678_v14, %s1738_s8  ;;  %643 = vrot.lane.b32.xlu2 %v639_v24, %s1737_s7 }
  0xf6   :  { %v367_v18 = vpop.permute.xlu1 %366 }
  0xfa   :  { %v661_v19 = vld.sshfl [vmem:[#allocation1 + $0x8] sm:$0xff pattern:$0x75316420]  ;;  %v660_v20 = vld.sshfl [vmem:[#allocation1] sm:$0xff pattern:$0x75316420] }
  0xfb   :  { %v324_v22 = vpop.permute.xlu0 %323  ;;  %673 = vst [vmem:[#allocation1] ss:$2 sm:$0xff] %v1798_v16 }
  0xfc   :  { %618 = vrot.lane.b32.xlu1 %v614_v3, %s1734_s29  ;;  %v330_v25 = vsel %vm2420_vm12, %v324_v22, %v326_v43  ;;  %v703_v43 = vld [vmem:[#allocation3 + $0x38] sm:$0xff] }
  0xfd   :  { %641 = vrot.lane.b32.xlu0 %v638_v11, %s1737_s7  ;;  %334 = vst [vmem:[#allocation3 + $0x58] sm:$0xf0] %v330_v25 }
  0xfe   :  { %v365_v26 = vpop.permute.xlu1 %364  ;;  %v1995_v27 = vpop.permute.xlu2 %455 }
  0xff   :  { %v370_v31 = vsel %vm2419_vm13, %v365_v26, %v367_v18 }
 0x102   :  { %v677_v29 = vld.sshfl [vmem:[#allocation1 + $0x8] sm:$0xff pattern:$0x75316420]  ;;  %v676_v8 = vld.sshfl [vmem:[#allocation1] sm:$0xff pattern:$0x75316420] }
 0x103   :  { %681 = vrot.lane.b32.xlu2 %v677_v29, %s1738_s8  ;;  %v349_v30 = vpop.permute.xlu0 %348 }
 0x104   :  { %679 = vrot.lane.b32.xlu1 %v676_v8, %s1738_s8  ;;  %v353_v60 = vsel %vm256_vm10, %v349_v30, %v351_v15 }
 0x105   :  { %665 = vrot.lane.b32.xlu0 %v661_v19, %s1735_s30  ;;  %v374_v32 = vsel %vm1894_vm6, %v353_v60, %v370_v31 }
 0x106   :  { %376 = vst [vmem:[#allocation3 + $0x78] sm:$0xf] %v374_v32  ;;  %v363_v33 = vpop.permute.xlu1 %362  ;;  %v2004_v5 = vpop.permute.xlu2 %451 }
 0x107   :  { %v369_v37 = vsel %vm2419_vm13, %v363_v33, %v365_v26 }
 0x10b   :  { %433 = vrot.lane.b32.xlu2 %v1874_v23, %s1731_s26  ;;  %v347_v36 = vpop.permute.xlu0 %346  ;;  %v707_v23 = vld [vmem:[#allocation3 + $0x70] sm:$0xff] }
 0x10c   :  { %404 = vrot.lane.b32.xlu1 %v1870_v21, %s1730_s25  ;;  %v352_v38 = vsel %vm256_vm10, %v347_v36, %v349_v30 }
 0x10d   :  { %663 = vrot.lane.b32.xlu0 %v660_v20, %s1735_s30  ;;  %v373_v39 = vsel %vm1909_vm7, %v352_v38, %v369_v37  ;;  %v711_v40 = vld [vmem:[#allocation3 + $0x78] sm:$0xf] }
 0x10e   :  { %375 = vst [vmem:[#allocation3 + $0x8] sm:$0xf] %v373_v39  ;;  %v80_v41 = vpop.permute.xlu1 %79  ;;  %1641 = vmatpush.msk.msra.mxu1 %vm724_vm14, %v711_v40  ;;  %v2016_v42 = vpop.permute.xlu2 %497 }
 0x10f   :  { %v86_v45 = vsel %vm85_vm1, %v80_v41, %v1863_v13 }
 0x110   :  { %769 = vmatpush.msra.mxu1 %v707_v23 }
 0x112   :  { %770 = vmatpush.msra.mxu1 %v703_v43 }
 0x113   :  { %429 = vrot.lane.b32.xlu2 %v1882_v28, %s1731_s26  ;;  %v63_v21 = vpop.permute.xlu0 %62 }
 0x114   :  { %v69_v47 = vsel %vm68_vm0, %v63_v21, %v1848_v0  ;;  %771 = vmatpush.msra.mxu1 %v699_v44  ;;  %v702_v0 = vld [vmem:[#allocation3 + $0x60] sm:$0xff] }
 0x115   :  { %388 = vrot.lane.b32.xlu0 %v1852_v9, %s1729_s0  ;;  %v90_v28 = vsel %vm1934_vm9, %v69_v47, %v86_v45  ;;  %v710_v49 = vld [vmem:[#allocation3 + $0x8] sm:$0xf]  ;;  %v706_v9 = vld [vmem:[#allocation3 + $0x58] sm:$0xff] }
 0x116   :  { %92 = vst [vmem:[#allocation3] sm:$0xf] %v90_v28  ;;  %v2033_v13 = vpop.permute.xlu1 %390  ;;  %1639 = vmatpush.msk.msra.mxu0 %vm724_vm14, %v710_v49  ;;  %772 = vmatpush.msra.mxu1 %v695_v50  ;;  %v494_v52 = vpop.permute.xlu2 %493 }
 0x117   :  { %1642 = vmatmul.msk.f32.vlgmr.msra.gmra.mxu1 %vm720_vm15, %v2029_v48  ;;  %v395_v56 = vsel %vm68_vm0, %v2033_v13, %v1988_v17 }
 0x118   :  { %749 = vmatpush.msra.mxu0 %v706_v9 }
 0x11a   :  { %750 = vmatpush.msra.mxu0 %v702_v0 }
 0x11b   :  { %v2041_v54 = vpop.permute.xlu0 %406 }
 0x11c   :  { %751 = vmatpush.msra.mxu0 %v698_v55 }
 0x11d   :  { %717 = vperm.xlu0 %1671, %v714_v53   ;;  %v694_v57 = vld [vmem:[#allocation3] sm:$0xff] }
 0x11e   :  { %v409_v51 = vpop.permute.xlu1 %408  ;;  %752 = vmatpush.msra.mxu0 %v694_v57  ;;  %v557_v62 = vpop.permute.xlu2 %556 }
 0x11f   :  { %v411_v58 = vsel %vm85_vm1, %v2041_v54, %v409_v51  ;;  %1640 = vmatmul.msk.f32.vlgmr.msra.gmra.mxu0 %vm720_vm15, %v2029_v48 }
 0x120   :  { %v415_v59 = vsel %vm1859_vm2, %v395_v56, %v411_v58 }
 0x121   :  { %417 = vst [vmem:[#allocation3 + $0x80] sm:$0xf] %v415_v59 }
 0x123   :  { %v470_v61 = vpop.permute.xlu0 %469 }
 0x126   :  { %v432_v63 = vpop.permute.xlu1 %431 }
 0x12b   :  { %v468_v2 = vpop.permute.xlu0 %467 }
 0x12c   :  { %v473_v3 = vsel %vm151_vm5, %v468_v2, %v470_v61  ;;  %v553_v4 = vpop.permute.xlu2 %552 }
 0x12e   :  { %v454_v6 = vpop.permute.xlu1 %453 }
 0x12f   :  { %v457_v7 = vsel %vm134_vm4, %v2004_v5, %v454_v6  ;;  %v458_v15 = vsel %vm134_vm4, %v454_v6, %v1995_v27 }
 0x130   :  { %v477_v24 = vsel %vm1909_vm7, %v457_v7, %v473_v3 }
 0x131   :  { %479 = vst [vmem:[#allocation3 + $0x18] sm:$0xf] %v477_v24 }
 0x133   :  { %v514_v11 = vpop.permute.xlu0 %513 }
 0x136   :  { %v472_v14 = vpop.permute.xlu1 %471 }
 0x137   :  { %v474_v17 = vsel %vm151_vm5, %v470_v61, %v472_v14  ;;  %v621_v18 = vpop.permute.xlu2 %620 }
 0x138   :  { %v478_v19 = vsel %vm1894_vm6, %v458_v15, %v474_v17 }
 0x139   :  { %480 = vst [vmem:[#allocation3 + $0x20] sm:$0xf] %v478_v19 }
 0x13b   :  { %v512_v20 = vpop.permute.xlu0 %511 }
 0x13c   :  { %v517_v22 = vsel %vm68_vm0, %v512_v20, %v514_v11 }
 0x13e   :  { %v496_v25 = vpop.permute.xlu1 %495 }
 0x13f   :  { %v499_v26 = vsel %vm178_vm8, %v494_v52, %v496_v25  ;;  %v603_v29 = vpop.permute.xlu2 %602  ;;  %v500_v60 = vsel %vm178_vm8, %v496_v25, %v2016_v42 }
 0x140   :  { %v521_v8 = vsel %vm1934_vm9, %v499_v26, %v517_v22 }
 0x141   :  { %v525_v30 = vrot.slane %v521_v8, 4 }
 0x143   :  { %529 = vst [vmem:[#allocation3 + $0x18] sm:$0xf0] %v525_v30 }
 0x146   :  { %v516_v27 = vpop.permute.xlu1 %515  ;;  %v605_v31 = vpop.permute.xlu0 %604 }
 0x147   :  { %v518_v32 = vsel %vm68_vm0, %v514_v11, %v516_v27  ;;  %v617_v35 = vpop.permute.xlu2 %616  ;;  %v607_v57 = vsel %vm287_vm11, %v603_v29, %v605_v31 }
 0x148   :  { %v522_v33 = vsel %vm1859_vm2, %v500_v60, %v518_v32 }
 0x149   :  { %v526_v5 = vrot.slane %v522_v33, 4 }
 0x14b   :  { %530 = vst [vmem:[#allocation3 + $0x20] sm:$0xf0] %v526_v5 }
 0x14e   :  { %v575_v36 = vpop.permute.xlu1 %574  ;;  %v573_v37 = vpop.permute.xlu0 %572 }
 0x14f   :  { %v644_v38 = vpop.permute.xlu2 %643  ;;  %v577_v41 = vsel %vm256_vm10, %v573_v37, %v575_v36 }
 0x152   :  { %v701_v8 = vld [vmem:[#allocation3 + $0x20] sm:$0xff] }
 0x156   :  { %v555_v39 = vpop.permute.xlu1 %554  ;;  %v571_v40 = vpop.permute.xlu0 %570 }
 0x157   :  { %v558_v23 = vsel %vm151_vm5, %v553_v4, %v555_v39  ;;  %v559_v43 = vsel %vm151_vm5, %v555_v39, %v557_v62  ;;  %v576_v42 = vsel %vm256_vm10, %v571_v40, %v573_v37 }
 0x158   :  { %v581_v21 = vsel %vm1894_vm6, %v559_v43, %v577_v41  ;;  %v580_v44 = vsel %vm1909_vm7, %v558_v23, %v576_v42 }
 0x159   :  { %v585_v45 = vrot.slane %v581_v21, 4  ;;  %v584_v47 = vrot.slane %v580_v44, 4 }
 0x15b   :  { %589 = vst [vmem:[#allocation3 + $0x30] sm:$0xf0] %v585_v45 }
 0x15c   :  { %588 = vst [vmem:[#allocation3 + $0x98] sm:$0xf0] %v584_v47 }
 0x15d   :  { %v682_v28 = vpop.permute.xlu2 %681 }
 0x15e   :  { %v646_v49 = vpop.permute.xlu0 %645  ;;  %v601_v50 = vpop.permute.xlu1 %600 }
 0x15f   :  { %v648_v9 = vsel %vm2420_vm12, %v644_v38, %v646_v49  ;;  %v606_v61 = vsel %vm287_vm11, %v601_v50, %v603_v29 }
 0x160   :  { %652 = vst [vmem:[#allocation3 + $0x88] sm:$0xf0] %v648_v9 }
 0x162   :  { %v705_v26 = vld [vmem:[#allocation3 + $0x30] sm:$0xff] }
 0x163   :  { %v704_v5 = vld [vmem:[#allocation3 + $0x98] sm:$0xff] }
 0x165   :  { %v434_v0 = vpop.permute.xlu2 %433 }
 0x166   :  { %v668_v53 = vpop.permute.xlu1 %667  ;;  %v436_v55 = vsel %vm111_vm3, %v432_v63, %v434_v0 }
 0x167   :  { %v684_v52 = vpop.permute.xlu0 %683  ;;  %440 = vst [vmem:[#allocation3 + $0x80] sm:$0xf0] %v436_v55 }
 0x16d   :  { %v430_v56 = vpop.permute.xlu2 %429 }
 0x16e   :  { %v619_v51 = vpop.permute.xlu1 %618  ;;  %v435_v59 = vsel %vm111_vm3, %v430_v56, %v432_v63  ;;  %v686_v63 = vsel %vm2419_vm13, %v682_v28, %v684_v52  ;;  %v697_v32 = vld [vmem:[#allocation3 + $0x80] sm:$0xff] }
 0x16f   :  { %v642_v58 = vpop.permute.xlu0 %641  ;;  %v622_v62 = vsel %vm178_vm8, %v617_v35, %v619_v51  ;;  %v623_v2 = vsel %vm178_vm8, %v619_v51, %v621_v18  ;;  %439 = vst [vmem:[#allocation3 + $0x48] sm:$0xf0] %v435_v59  ;;  %v941_v59 = vld [vmem:[#allocation2 + $0xc] sm:$0xf] }
 0x170   :  { %v647_v3 = vsel %vm2420_vm12, %v642_v58, %v644_v38  ;;  %v626_v4 = vsel %vm1934_vm9, %v606_v61, %v622_v62  ;;  %v627_v6 = vsel %vm1859_vm2, %v607_v57, %v623_v2 }
 0x171   :  { %651 = vst [vmem:[#allocation3 + $0x40] sm:$0xf0] %v647_v3 }
 0x172   :  { %628 = vst [vmem:[#allocation3 + $0x40] sm:$0xf] %v626_v4 }
 0x173   :  { %629 = vst [vmem:[#allocation3 + $0x88] sm:$0xf] %v627_v6 }
 0x176   :  { %v680_v14 = vpop.permute.xlu1 %679 }
 0x177   :  { %v666_v7 = vpop.permute.xlu0 %665  ;;  %v685_v17 = vsel %vm2419_vm13, %v680_v14, %v682_v28 }
 0x178   :  { %v670_v24 = vsel %vm256_vm10, %v666_v7, %v668_v53 }
 0x179   :  { %v690_v11 = vsel %vm1894_vm6, %v670_v24, %v686_v63  ;;  %v708_v33 = vld [vmem:[#allocation3 + $0x40] sm:$0xff] }
 0x17a   :  { %692 = vst [vmem:[#allocation3 + $0x90] sm:$0xf] %v690_v11  ;;  %v709_v22 = vld [vmem:[#allocation3 + $0x88] sm:$0xff] }
 0x17e   :  { %v405_v25 = vpop.permute.xlu1 %404 }
 0x17f   :  { %v664_v15 = vpop.permute.xlu0 %663  ;;  %v410_v30 = vsel %vm85_vm1, %v405_v25, %v2041_v54  ;;  %v700_v54 = vld [vmem:[#allocation3 + $0x18] sm:$0xff] }
 0x180   :  { %v669_v18 = vsel %vm256_vm10, %v664_v15, %v666_v7  ;;  %v998_v15 = vld [vmem:[#allocation2 + $0xc] sm:$0xf] }
 0x181   :  { %v689_v19 = vsel %vm1909_vm7, %v669_v18, %v685_v17  ;;  %v713_v20 = vld [vmem:[#allocation3 + $0x90] sm:$0xf]  ;;  %v1048_v25 = vld [vmem:[#allocation2 + $0xc] sm:$0xf] }
 0x182   :  { %691 = vst [vmem:[#allocation3 + $0x50] sm:$0xf] %v689_v19  ;;  %1645 = vmatpush.msk.msra.mxu3 %vm724_vm14, %v713_v20 }
 0x184   :  { %809 = vmatpush.msra.mxu3 %v709_v22 }
 0x186   :  { %810 = vmatpush.msra.mxu3 %v705_v26 }
 0x187   :  { %v389_v29 = vpop.permute.xlu0 %388 }
 0x188   :  { %v394_v27 = vsel %vm68_vm0, %v389_v29, %v2033_v13  ;;  %811 = vmatpush.msra.mxu3 %v701_v8 }
 0x189   :  { %v414_v31 = vsel %vm1934_vm9, %v394_v27, %v410_v30  ;;  %v712_v60 = vld [vmem:[#allocation3 + $0x50] sm:$0xf] }
 0x18a   :  { %416 = vst [vmem:[#allocation3 + $0x48] sm:$0xf] %v414_v31  ;;  %1643 = vmatpush.msk.msra.mxu2 %vm724_vm14, %v712_v60  ;;  %812 = vmatpush.msra.mxu3 %v697_v32  ;;  %v1088_v60 = vld [vmem:[#allocation2 + $0xc] sm:$0xf] }
 0x18b   :  { %1646 = vmatmul.msk.f32.vlgmr.msra.gmra.mxu3 %vm720_vm15, %v2029_v48 }
 0x18c   :  { %789 = vmatpush.msra.mxu2 %v708_v33 }
 0x18e   :  { %790 = vmatpush.msra.mxu2 %v704_v5 }
 0x18f   :  { %v2111_v35 = vpop.permute.xlu0 %717 }
 0x190   :  { %791 = vmatpush.msra.mxu2 %v700_v54  ;;  %v1111_v54 = vld [vmem:[#allocation2 + $0xc] sm:$0xf] }
 0x191   :  { %v696_v13 = vld [vmem:[#allocation3 + $0x48] sm:$0xff] }
 0x192   :  { %792 = vmatpush.msra.mxu2 %v696_v13 }
 0x193   :  { %1644 = vmatmul.msk.f32.vlgmr.msra.gmra.mxu2 %vm720_vm15, %v2029_v48 }
 0x194   :  { %v774_v36 = vpop.f32.mrf.mxu1 }
 0x195   :  { %v775_v37 = vadd.f32 %v774_v36, %v2111_v35 }
 0x197   :  { %v822_v38 = vmul.f32 0.01, %v775_v37  ;;  %vm818_vm13 = vcmp.ge.f32.partialorder %v775_v37, 0.0 }
 0x199   :  { %v826_v40 = vsel %vm818_vm13, %v775_v37, %v822_v38 }
 0x19a   :  { %v831_v43 = vrot.slane %v826_v40, 4 }
 0x19c   :  { %v754_v39 = vpop.f32.mrf.mxu0 }
 0x19d   :  { %v755_v41 = vadd.f32 %v754_v39, %v2111_v35 }
 0x19f   :  { %vm817_vm12 = vcmp.ge.f32.partialorder %v755_v41, 0.0  ;;  %v821_v23 = vmul.f32 0.01, %v755_v41 }
 0x1a1   :  { %v825_v42 = vsel %vm817_vm12, %v755_v41, %v821_v23 }
 0x1a2   :  { %v2116_v21 = vsel %vm724_vm14, %v825_v42, %v831_v43 }
 0x1a3   :  { %834 = vst [vmem:[#allocation2 + $0x4] sm:$0xff] %v2116_v21 }
 0x1aa   :  { %v2119_v48 = vld [vmem:[#allocation2] sm:$0xff]  ;;  %v836_v44 = vld [vmem:[#allocation2 + $0x8] sm:$0xf] }
 0x1ab   :  { %839 = vst [vmem:[#allocation1] ss:$2 sm:$0xff] %v2119_v48  ;;  %v876_v49 = vld [vmem:[#allocation2 + $0x8] sm:$0xf] }
 0x1ac   :  { %841 = vst [vmem:[#allocation1 + $0x10] ss:$2 sm:$0xff] %v836_v44  ;;  %v899_v52 = vld [vmem:[#allocation2 + $0x8] sm:$0xf] }
 0x1ad   :  { %v939_v3 = vld [vmem:[#allocation2 + $0x8] sm:$0xf] }
 0x1ae   :  { %v1000_v63 = vld [vmem:[#allocation2 + $0x8] sm:$0xf] }
 0x1b2   :  { %v842_v45 = vld.sshfl [vmem:[#allocation1] sm:$0xff pattern:$0x75316420]  ;;  %v843_v47 = vld.sshfl [vmem:[#allocation1 + $0x8] sm:$0xff pattern:$0x75316420] }
 0x1b3   :  { %855 = vst [vmem:[#allocation1] ss:$2 sm:$0xff] %v2119_v48  ;;  %847 = vrot.lane.b32.xlu2 %v843_v47, %s1729_s0  ;;  %845 = vrot.lane.b32.xlu1 %v842_v45, %s1729_s0  ;;  %v844_v28 = vld.sshfl [vmem:[#allocation1 + $0x10] sm:$0xff pattern:$0x75316420] }
 0x1b4   :  { %857 = vst [vmem:[#allocation1 + $0x10] ss:$2 sm:$0xff] %v836_v44 }
 0x1ba   :  { %v858_v50 = vld.sshfl [vmem:[#allocation1] sm:$0xff pattern:$0x75316420]  ;;  %v859_v9 = vld.sshfl [vmem:[#allocation1 + $0x8] sm:$0xff pattern:$0x75316420] }
 0x1bb   :  { %880 = vst [vmem:[#allocation1 + $0x1] ss:$2 sm:$0xff] %v2119_v48  ;;  %849 = vrot.lane.b32.xlu1 %v844_v28, %s1729_s0  ;;  %863 = vrot.lane.b32.xlu0 %v859_v9, %s1730_s25  ;;  %v860_v0 = vld.sshfl [vmem:[#allocation1 + $0x10] sm:$0xff pattern:$0x75316420] }
 0x1bc   :  { %861 = vrot.lane.b32.xlu2 %v858_v50, %s1730_s25  ;;  %882 = vst [vmem:[#allocation1 + $0x11] ss:$2 sm:$0xff] %v876_v49 }
 0x1c2   :  { %v883_v53 = vld.sshfl [vmem:[#allocation1] sm:$0xff pattern:$0x75316420]  ;;  %v884_v55 = vld.sshfl [vmem:[#allocation1 + $0x8] sm:$0xff pattern:$0x75316420] }
 0x1c3   :  { %902 = vst [vmem:[#allocation1] ss:$2 sm:$0xff] %v2119_v48  ;;  %865 = vrot.lane.b32.xlu1 %v860_v0, %s1730_s25  ;;  %888 = vrot.lane.b32.xlu0 %v884_v55, %s1731_s26  ;;  %v885_v56 = vld.sshfl [vmem:[#allocation1 + $0x10] sm:$0xff pattern:$0x75316420] }
 0x1c4   :  { %886 = vrot.lane.b32.xlu2 %v883_v53, %s1731_s26  ;;  %904 = vst [vmem:[#allocation1 + $0x10] ss:$2 sm:$0xff] %v899_v52 }
 0x1ca   :  { %v905_v57 = vld.sshfl [vmem:[#allocation1] sm:$0xff pattern:$0x75316420]  ;;  %v906_v51 = vld.sshfl [vmem:[#allocation1 + $0x8] sm:$0xff pattern:$0x75316420] }
 0x1cb   :  { %918 = vst [vmem:[#allocation1] ss:$2 sm:$0xff] %v2119_v48  ;;  %890 = vrot.lane.b32.xlu1 %v885_v56, %s1731_s26  ;;  %910 = vrot.lane.b32.xlu0 %v906_v51, %s1732_s27  ;;  %v907_v58 = vld.sshfl [vmem:[#allocation1 + $0x10] sm:$0xff pattern:$0x75316420] }
 0x1cc   :  { %908 = vrot.lane.b32.xlu2 %v905_v57, %s1732_s27  ;;  %920 = vst [vmem:[#allocation1 + $0x10] ss:$2 sm:$0xff] %v899_v52 }
 0x1d2   :  { %v921_v61 = vld.sshfl [vmem:[#allocation1] sm:$0xff pattern:$0x75316420]  ;;  %v922_v62 = vld.sshfl [vmem:[#allocation1 + $0x8] sm:$0xff pattern:$0x75316420] }
 0x1d3   :  { %944 = vst [vmem:[#allocation1] ss:$2 sm:$0xff] %v2116_v21  ;;  %912 = vrot.lane.b32.xlu1 %v907_v58, %s1732_s27  ;;  %926 = vrot.lane.b32.xlu0 %v922_v62, %s1733_s28  ;;  %v923_v2 = vld.sshfl [vmem:[#allocation1 + $0x10] sm:$0xff pattern:$0x75316420] }
 0x1d4   :  { %924 = vrot.lane.b32.xlu2 %v921_v61, %s1733_s28  ;;  %946 = vst [vmem:[#allocation1 + $0x10] ss:$2 sm:$0xff] %v941_v59 }
 0x1da   :  { %v947_v4 = vld.sshfl [vmem:[#allocation1] sm:$0xff pattern:$0x75316420]  ;;  %v948_v6 = vld.sshfl [vmem:[#allocation1 + $0x8] sm:$0xff pattern:$0x75316420] }
 0x1db   :  { %962 = vst [vmem:[#allocation1] ss:$2 sm:$0xff] %v2119_v48  ;;  %928 = vrot.lane.b32.xlu1 %v923_v2, %s1733_s28  ;;  %952 = vrot.lane.b32.xlu0 %v948_v6, %s1734_s29  ;;  %v949_v7 = vld.sshfl [vmem:[#allocation1 + $0x10] sm:$0xff pattern:$0x75316420] }
 0x1dc   :  { %950 = vrot.lane.b32.xlu2 %v947_v4, %s1734_s29  ;;  %964 = vst [vmem:[#allocation1 + $0x10] ss:$2 sm:$0xff] %v939_v3 }
 0x1e2   :  { %v965_v24 = vld.sshfl [vmem:[#allocation1] sm:$0xff pattern:$0x75316420]  ;;  %v966_v11 = vld.sshfl [vmem:[#allocation1 + $0x8] sm:$0xff pattern:$0x75316420] }
 0x1e3   :  { %990 = vst [vmem:[#allocation1] ss:$2 sm:$0xff] %v2116_v21  ;;  %954 = vrot.lane.b32.xlu1 %v949_v7, %s1734_s29  ;;  %v967_v14 = vld.sshfl [vmem:[#allocation1 + $0x10] sm:$0xff pattern:$0x75316420] }
 0x1e4   :  { %968 = vrot.lane.b32.xlu2 %v965_v24, %s1729_s0  ;;  %1005 = vst [vmem:[#allocation1 + $0x10] ss:$2 sm:$0xff] %v1000_v63 }
 0x1ea   :  { %v991_v17 = vld.sshfl [vmem:[#allocation1] sm:$0xff pattern:$0x75316420]  ;;  %v992_v18 = vld.sshfl [vmem:[#allocation1 + $0x8] sm:$0xff pattern:$0x75316420] }
 0x1eb   :  { %1003 = vst [vmem:[#allocation1] ss:$2 sm:$0xff] %v2119_v48  ;;  %v1008_v19 = vld.sshfl [vmem:[#allocation1 + $0x10] sm:$0xff pattern:$0x75316420]  ;;  %970 = vrot.lane.b32.xlu1 %v966_v11, %s1729_s0 }
 0x1ec   :  { %995 = vst [vmem:[#allocation3 + $0x60] sm:$0xf] %v991_v17  ;;  %1013 = vrot.lane.b32.xlu0 %v1008_v19, %s1733_s28  ;;  %972 = vrot.lane.b32.xlu2 %v967_v14, %s1729_s0 }
 0x1ed   :  { %996 = vst [vmem:[#allocation3 + $0x38] sm:$0xf] %v992_v18 }
 0x1ee   :  { %1023 = vst [vmem:[#allocation1 + $0x10] ss:$2 sm:$0xff] %v998_v15 }
 0x1f2   :  { %v1006_v20 = vld.sshfl [vmem:[#allocation1] sm:$0xff pattern:$0x75316420]  ;;  %v1007_v22 = vld.sshfl [vmem:[#allocation1 + $0x8] sm:$0xff pattern:$0x75316420] }
 0x1f3   :  { %1021 = vst [vmem:[#allocation1] ss:$2 sm:$0xff] %v2116_v21 }
 0x1f4   :  { %1011 = vrot.lane.b32.xlu2 %v1007_v22, %s1733_s28  ;;  %1009 = vrot.lane.b32.xlu0 %v1006_v20, %s1733_s28 }
 0x1f5   :  { %v1026_v26 = vld.sshfl [vmem:[#allocation1 + $0x10] sm:$0xff pattern:$0x75316420] }
 0x1f6   :  { %1053 = vst [vmem:[#allocation1 + $0x10] ss:$2 sm:$0xff] %v1048_v25 }
 0x1fa   :  { %v1024_v29 = vld.sshfl [vmem:[#allocation1] sm:$0xff pattern:$0x75316420]  ;;  %v1025_v8 = vld.sshfl [vmem:[#allocation1 + $0x8] sm:$0xff pattern:$0x75316420] }
 0x1fb   :  { %1051 = vst [vmem:[#allocation1] ss:$2 sm:$0xff] %v2116_v21  ;;  %1029 = vrot.lane.b32.xlu1 %v1025_v8, %s1735_s30 }
 0x1fc   :  { %1031 = vrot.lane.b32.xlu2 %v1026_v26, %s1735_s30 }
 0x1fd   :  { %v1056_v30 = vld.sshfl [vmem:[#allocation1 + $0x10] sm:$0xff pattern:$0x75316420] }
 0x1fe   :  { %1069 = vst [vmem:[#allocation1 + $0x10] ss:$2 sm:$0xff] %v1048_v25 }
 0x202   :  { %v2158_v27 = vld.sshfl [vmem:[#allocation1] sm:$0xff pattern:$0x75316420]  ;;  %v1055_v31 = vld.sshfl [vmem:[#allocation1 + $0x8] sm:$0xff pattern:$0x75316420] }
 0x203   :  { %1067 = vst [vmem:[#allocation1] ss:$2 sm:$0xff] %v2116_v21  ;;  %1061 = vrot.lane.b32.xlu1 %v1056_v30, %s1736_s6  ;;  %1059 = vrot.lane.b32.xlu0 %v1055_v31, %s1736_s6 }
 0x205   :  { %v1072_v32 = vld.sshfl [vmem:[#allocation1 + $0x10] sm:$0xff pattern:$0x75316420] }
 0x206   :  { %1094 = vst [vmem:[#allocation1 + $0x11] ss:$2 sm:$0xff] %v1088_v60 }
 0x20a   :  { %v2163_v33 = vld.sshfl [vmem:[#allocation1] sm:$0xff pattern:$0x75316420]  ;;  %v1071_v5 = vld.sshfl [vmem:[#allocation1 + $0x8] sm:$0xff pattern:$0x75316420] }
 0x20b   :  { %1027 = vrot.lane.b32.xlu1 %v1024_v29, %s1735_s30  ;;  %1077 = vrot.lane.b32.xlu0 %v1072_v32, %s1734_s29  ;;  %1092 = vst [vmem:[#allocation1 + $0x1] ss:$2 sm:$0xff] %v2116_v21 }
 0x20c   :  { %1075 = vrot.lane.b32.xlu2 %v1071_v5, %s1734_s29 }
 0x20d   :  { %v1097_v36 = vld.sshfl [vmem:[#allocation1 + $0x10] sm:$0xff pattern:$0x75316420]  ;;  %v848_v39 = vpop.permute.xlu2 %847 }
 0x20e   :  { %v814_v13 = vpop.f32.mrf.mxu3  ;;  %1116 = vst [vmem:[#allocation1 + $0x10] ss:$2 sm:$0xff] %v1111_v54 }
 0x20f   :  { %v815_v37 = vadd.f32 %v814_v13, %v2111_v35 }
 0x211   :  { %v824_v38 = vmul.f32 0.01, %v815_v37  ;;  %vm820_vm12 = vcmp.ge.f32.partialorder %v815_v37, 0.0 }
 0x212   :  { %v2170_v40 = vld.sshfl [vmem:[#allocation1] sm:$0xff pattern:$0x75316420]  ;;  %v1096_v41 = vld.sshfl [vmem:[#allocation1 + $0x8] sm:$0xff pattern:$0x75316420] }
 0x213   :  { %1114 = vst [vmem:[#allocation1] ss:$2 sm:$0xff] %v2116_v21  ;;  %1102 = vrot.lane.b32.xlu1 %v1097_v36, %s1737_s7  ;;  %1100 = vrot.lane.b32.xlu0 %v1096_v41, %s1737_s7  ;;  %v828_v42 = vsel %vm820_vm12, %v815_v37, %v824_v38  ;;  %v1262_v41 = vld [vmem:[#allocation2 + $0xc] sm:$0xf]  ;;  %vm2429_vm12 = vcmask 916480  }
 0x214   :  { %v1152_v45 = vrot.slane %v828_v42, 4 }
 0x215   :  { %v1119_v43 = vld.sshfl [vmem:[#allocation1 + $0x10] sm:$0xff pattern:$0x75316420] }
 0x216   :  { %v794_v23 = vpop.f32.mrf.mxu2  ;;  %1124 = vrot.lane.b32.xlu2 %v1119_v43, %s1735_s30  ;;  %1132 = vst [vmem:[#allocation1 + $0x10] ss:$2 sm:$0xff] %v1111_v54  ;;  %v862_v9 = vpop.permute.xlu2 %861 }
 0x217   :  { %v795_v48 = vadd.f32 %v794_v23, %v2111_v35 }
 0x219   :  { %vm819_vm13 = vcmp.ge.f32.partialorder %v795_v48, 0.0  ;;  %v823_v44 = vmul.f32 0.01, %v795_v48 }
 0x21a   :  { %v1117_v28 = vld.sshfl [vmem:[#allocation1] sm:$0xff pattern:$0x75316420]  ;;  %v1118_v49 = vld.sshfl [vmem:[#allocation1 + $0x8] sm:$0xff pattern:$0x75316420] }
 0x21b   :  { %v827_v47 = vsel %vm819_vm13, %v795_v48, %v823_v44  ;;  %1130 = vst [vmem:[#allocation1] ss:$2 sm:$0xff] %v2116_v21  ;;  %1122 = vrot.lane.b32.xlu1 %v1118_v49, %s1735_s30  ;;  %vm2430_vm13 = vcmask 908288  }
 0x21c   :  { %v2179_v50 = vsel %vm724_vm14, %v827_v47, %v1152_v45 }
 0x21d   :  { %1155 = vst [vmem:[#allocation2 + $0x4] sm:$0xff] %v2179_v50  ;;  %v1135_v35 = vld.sshfl [vmem:[#allocation1 + $0x10] sm:$0xff pattern:$0x75316420] }
 0x21e   :  { %v887_v56 = vpop.permute.xlu2 %886 }
 0x222   :  { %v1133_v0 = vld.sshfl [vmem:[#allocation1] sm:$0xff pattern:$0x75316420]  ;;  %v1134_v52 = vld.sshfl [vmem:[#allocation1 + $0x8] sm:$0xff pattern:$0x75316420] }
 0x223   :  { %1140 = vrot.lane.b32.xlu1 %v1135_v35, %s1738_s8  ;;  %1138 = vrot.lane.b32.xlu0 %v1134_v52, %s1738_s8 }
 0x224   :  { %v2183_v53 = vld [vmem:[#allocation2] sm:$0xff]  ;;  %v1157_v55 = vld [vmem:[#allocation2 + $0x8] sm:$0xf]  ;;  %1136 = vrot.lane.b32.xlu2 %v1133_v0, %s1738_s8 }
 0x225   :  { %1160 = vst [vmem:[#allocation1] ss:$2 sm:$0xff] %v2183_v53  ;;  %v846_v21 = vpop.permute.xlu1 %845  ;;  %v1197_v6 = vld [vmem:[#allocation2 + $0x8] sm:$0xf] }
 0x226   :  { %1162 = vst [vmem:[#allocation1 + $0x10] ss:$2 sm:$0xff] %v1157_v55  ;;  %v851_v62 = vsel %vm68_vm0, %v846_v21, %v848_v39  ;;  %v909_v4 = vpop.permute.xlu2 %908  ;;  %v1220_v20 = vld [vmem:[#allocation2 + $0x8] sm:$0xf] }
 0x227   :  { %v1260_v49 = vld [vmem:[#allocation2 + $0x8] sm:$0xf] }
 0x228   :  { %v1321_v21 = vld [vmem:[#allocation2 + $0x8] sm:$0xf] }
 0x22b   :  { %1120 = vrot.lane.b32.xlu1 %v1117_v28, %s1735_s30 }
 0x22c   :  { %v2189_v57 = vld.sshfl [vmem:[#allocation1] sm:$0xff pattern:$0x75316420]  ;;  %v1164_v51 = vld.sshfl [vmem:[#allocation1 + $0x8] sm:$0xff pattern:$0x75316420] }
 0x22d   :  { %1176 = vst [vmem:[#allocation1] ss:$2 sm:$0xff] %v2183_v53  ;;  %1168 = vrot.lane.b32.xlu0 %v1164_v51, %s1729_s0  ;;  %v1165_v58 = vld.sshfl [vmem:[#allocation1 + $0x10] sm:$0xff pattern:$0x75316420]  ;;  %v850_v59 = vpop.permute.xlu1 %849  ;;  %v864_v61 = vpop.permute.xlu0 %863 }
 0x22e   :  { %1178 = vst [vmem:[#allocation1 + $0x10] ss:$2 sm:$0xff] %v1157_v55  ;;  %v867_v2 = vsel %vm85_vm1, %v862_v9, %v864_v61  ;;  %v852_v15 = vsel %vm68_vm0, %v848_v39, %v850_v59  ;;  %v925_v22 = vpop.permute.xlu2 %924 }
 0x22f   :  { %v871_v3 = vsel %vm1934_vm9, %v851_v62, %v867_v2 }
 0x230   :  { %873 = vst [vmem:[#allocation3] sm:$0xf] %v871_v3 }
 0x233   :  { %1170 = vrot.lane.b32.xlu1 %v1165_v58, %s1729_s0 }
 0x234   :  { %v2198_v7 = vld.sshfl [vmem:[#allocation1] sm:$0xff pattern:$0x75316420]  ;;  %v1180_v63 = vld.sshfl [vmem:[#allocation1 + $0x8] sm:$0xff pattern:$0x75316420] }
 0x235   :  { %1201 = vst [vmem:[#allocation1 + $0x1] ss:$2 sm:$0xff] %v2183_v53  ;;  %v1181_v24 = vld.sshfl [vmem:[#allocation1 + $0x10] sm:$0xff pattern:$0x75316420]  ;;  %1184 = vrot.lane.b32.xlu2 %v1180_v63, %s1730_s25  ;;  %v866_v11 = vpop.permute.xlu1 %865  ;;  %v889_v14 = vpop.permute.xlu0 %888 }
 0x236   :  { %1186 = vrot.lane.b32.xlu0 %v1181_v24, %s1730_s25  ;;  %1203 = vst [vmem:[#allocation1 + $0x11] ss:$2 sm:$0xff] %v1197_v6  ;;  %v868_v17 = vsel %vm85_vm1, %v864_v61, %v866_v11  ;;  %v892_v18 = vsel %vm111_vm3, %v887_v56, %v889_v14  ;;  %v951_v5 = vpop.permute.xlu2 %950 }
 0x237   :  { %v872_v19 = vsel %vm1859_vm2, %v852_v15, %v868_v17  ;;  %896 = vst [vmem:[#allocation3] sm:$0xf0] %v892_v18 }
 0x238   :  { %874 = vst [vmem:[#allocation3 + $0x68] sm:$0xf] %v872_v19 }
 0x23c   :  { %v2209_v25 = vld.sshfl [vmem:[#allocation1] sm:$0xff pattern:$0x75316420]  ;;  %v1205_v26 = vld.sshfl [vmem:[#allocation1 + $0x8] sm:$0xff pattern:$0x75316420] }
 0x23d   :  { %1223 = vst [vmem:[#allocation1] ss:$2 sm:$0xff] %v2183_v53  ;;  %v1206_v29 = vld.sshfl [vmem:[#allocation1 + $0x10] sm:$0xff pattern:$0x75316420]  ;;  %1209 = vrot.lane.b32.xlu2 %v1205_v26, %s1731_s26  ;;  %v891_v8 = vpop.permute.xlu1 %890  ;;  %v911_v30 = vpop.permute.xlu0 %910 }
 0x23e   :  { %1211 = vrot.lane.b32.xlu0 %v1206_v29, %s1731_s26  ;;  %1225 = vst [vmem:[#allocation1 + $0x10] ss:$2 sm:$0xff] %v1220_v20  ;;  %v893_v31 = vsel %vm111_vm3, %v889_v14, %v891_v8  ;;  %v914_v37 = vsel %vm134_vm4, %v909_v4, %v911_v30  ;;  %v969_v44 = vpop.permute.xlu2 %968 }
 0x23f   :  { %897 = vst [vmem:[#allocation3 + $0x68] sm:$0xf0] %v893_v31 }
 0x244   :  { %v1226_v60 = vld.sshfl [vmem:[#allocation1] sm:$0xff pattern:$0x75316420]  ;;  %v1227_v32 = vld.sshfl [vmem:[#allocation1 + $0x8] sm:$0xff pattern:$0x75316420] }
 0x245   :  { %1239 = vst [vmem:[#allocation1] ss:$2 sm:$0xff] %v2183_v53  ;;  %v1228_v54 = vld.sshfl [vmem:[#allocation1 + $0x10] sm:$0xff pattern:$0x75316420]  ;;  %1231 = vrot.lane.b32.xlu2 %v1227_v32, %s1732_s27  ;;  %1229 = vrot.lane.b32.xlu1 %v1226_v60, %s1732_s27  ;;  %v913_v13 = vpop.permute.xlu1 %912  ;;  %v927_v36 = vpop.permute.xlu0 %926 }
 0x246   :  { %1233 = vrot.lane.b32.xlu0 %v1228_v54, %s1732_s27  ;;  %1241 = vst [vmem:[#allocation1 + $0x10] ss:$2 sm:$0xff] %v1220_v20  ;;  %v930_v38 = vsel %vm151_vm5, %v925_v22, %v927_v36  ;;  %v915_v45 = vsel %vm134_vm4, %v911_v30, %v913_v13  ;;  %v973_v55 = vpop.permute.xlu2 %972  ;;  %v1319_v20 = vld [vmem:[#allocation2 + $0xc] sm:$0xf] }
 0x247   :  { %v934_v39 = vsel %vm1909_vm7, %v914_v37, %v930_v38  ;;  %v1369_v30 = vld [vmem:[#allocation2 + $0xc] sm:$0xf] }
 0x248   :  { %936 = vst [vmem:[#allocation3 + $0x10] sm:$0xf] %v934_v39 }
 0x24c   :  { %v1242_v23 = vld.sshfl [vmem:[#allocation1] sm:$0xff pattern:$0x75316420]  ;;  %v1243_v43 = vld.sshfl [vmem:[#allocation1 + $0x8] sm:$0xff pattern:$0x75316420] }
 0x24d   :  { %1265 = vst [vmem:[#allocation1] ss:$2 sm:$0xff] %v2179_v50  ;;  %v1244_v42 = vld.sshfl [vmem:[#allocation1 + $0x10] sm:$0xff pattern:$0x75316420]  ;;  %1247 = vrot.lane.b32.xlu1 %v1243_v43, %s1733_s28  ;;  %v929_v48 = vpop.permute.xlu1 %928  ;;  %v953_v58 = vpop.permute.xlu0 %952 }
 0x24e   :  { %1249 = vrot.lane.b32.xlu2 %v1244_v42, %s1733_s28  ;;  %1267 = vst [vmem:[#allocation1 + $0x10] ss:$2 sm:$0xff] %v1262_v41  ;;  %v931_v47 = vsel %vm151_vm5, %v927_v36, %v929_v48  ;;  %v956_v62 = vsel %vm178_vm8, %v951_v5, %v953_v58  ;;  %v1012_v11 = vpop.permute.xlu2 %1011 }
 0x24f   :  { %v935_v28 = vsel %vm1894_vm6, %v915_v45, %v931_v47 }
 0x250   :  { %937 = vst [vmem:[#allocation3 + $0x28] sm:$0xf] %v935_v28 }
 0x254   :  { %v1268_v9 = vld.sshfl [vmem:[#allocation1] sm:$0xff pattern:$0x75316420]  ;;  %v1269_v35 = vld.sshfl [vmem:[#allocation1 + $0x8] sm:$0xff pattern:$0x75316420] }
 0x255   :  { %1283 = vst [vmem:[#allocation1] ss:$2 sm:$0xff] %v2183_v53  ;;  %1273 = vrot.lane.b32.xlu1 %v1269_v35, %s1734_s29  ;;  %1271 = vrot.lane.b32.xlu0 %v1268_v9, %s1734_s29  ;;  %v1270_v0 = vld.sshfl [vmem:[#allocation1 + $0x10] sm:$0xff pattern:$0x75316420]  ;;  %v955_v52 = vpop.permute.xlu1 %954 }
 0x256   :  { %1245 = vrot.lane.b32.xlu2 %v1242_v23, %s1733_s28  ;;  %1285 = vst [vmem:[#allocation1 + $0x10] ss:$2 sm:$0xff] %v1260_v49  ;;  %v957_v2 = vsel %vm178_vm8, %v953_v58, %v955_v52  ;;  %v1032_v29 = vpop.permute.xlu2 %1031  ;;  %v1409_v9 = vld [vmem:[#allocation2 + $0xc] sm:$0xf] }
 0x25c   :  { %v1286_v56 = vld.sshfl [vmem:[#allocation1] sm:$0xff pattern:$0x75316420]  ;;  %v1287_v51 = vld.sshfl [vmem:[#allocation1 + $0x8] sm:$0xff pattern:$0x75316420] }
 0x25d   :  { %1311 = vst [vmem:[#allocation1] ss:$2 sm:$0xff] %v2179_v50  ;;  %v1288_v59 = vld.sshfl [vmem:[#allocation1 + $0x10] sm:$0xff pattern:$0x75316420]  ;;  %1291 = vrot.lane.b32.xlu0 %v1287_v51, %s1729_s0  ;;  %v971_v61 = vpop.permute.xlu1 %970 }
 0x25e   :  { %1275 = vrot.lane.b32.xlu2 %v1270_v0, %s1734_s29  ;;  %1293 = vrot.lane.b32.xlu1 %v1288_v59, %s1729_s0  ;;  %1326 = vst [vmem:[#allocation1 + $0x10] ss:$2 sm:$0xff] %v1321_v21  ;;  %v974_v3 = vsel %vm68_vm0, %v969_v44, %v971_v61  ;;  %v975_v4 = vsel %vm68_vm0, %v971_v61, %v973_v55  ;;  %v1014_v18 = vpop.permute.xlu0 %1013 }
 0x25f   :  { %v978_v6 = vsel %vm1934_vm9, %v956_v62, %v974_v3  ;;  %v979_v63 = vsel %vm1859_vm2, %v957_v2, %v975_v4  ;;  %v1016_v31 = vsel %vm151_vm5, %v1012_v11, %v1014_v18  ;;  %v1432_v62 = vld [vmem:[#allocation2 + $0xc] sm:$0xf] }
 0x260   :  { %v982_v24 = vrot.slane %v978_v6, 4  ;;  %v983_v14 = vrot.slane %v979_v63, 4 }
 0x262   :  { %986 = vst [vmem:[#allocation3 + $0x10] sm:$0xf0] %v982_v24 }
 0x263   :  { %987 = vst [vmem:[#allocation3 + $0x28] sm:$0xf0] %v983_v14 }
 0x264   :  { %v1312_v15 = vld.sshfl [vmem:[#allocation1] sm:$0xff pattern:$0x75316420]  ;;  %v1313_v17 = vld.sshfl [vmem:[#allocation1 + $0x8] sm:$0xff pattern:$0x75316420] }
 0x265   :  { %1324 = vst [vmem:[#allocation1] ss:$2 sm:$0xff] %v2183_v53  ;;  %v1329_v19 = vld.sshfl [vmem:[#allocation1 + $0x10] sm:$0xff pattern:$0x75316420] }
 0x266   :  { %1316 = vst [vmem:[#allocation3 + $0x98] sm:$0xf] %v1312_v15  ;;  %1334 = vrot.lane.b32.xlu2 %v1329_v19, %s1733_s28  ;;  %1289 = vrot.lane.b32.xlu1 %v1286_v56, %s1729_s0  ;;  %v1010_v8 = vpop.permute.xlu0 %1009  ;;  %v2256_v37 = vpop.permute.xlu2 %1075 }
 0x267   :  { %1317 = vst [vmem:[#allocation3 + $0x30] sm:$0xf] %v1313_v17  ;;  %v1015_v45 = vsel %vm151_vm5, %v1010_v8, %v1012_v11 }
 0x268   :  { %1344 = vst [vmem:[#allocation1 + $0x10] ss:$2 sm:$0xff] %v1319_v20 }
 0x26c   :  { %v1327_v22 = vld.sshfl [vmem:[#allocation1] sm:$0xff pattern:$0x75316420]  ;;  %v1328_v26 = vld.sshfl [vmem:[#allocation1 + $0x8] sm:$0xff pattern:$0x75316420] }
 0x26d   :  { %1342 = vst [vmem:[#allocation1] ss:$2 sm:$0xff] %v2179_v50  ;;  %v1030_v53 = vpop.permute.xlu1 %1029 }
 0x26e   :  { %1332 = vrot.lane.b32.xlu1 %v1328_v26, %s1733_s28  ;;  %1330 = vrot.lane.b32.xlu2 %v1327_v22, %s1733_s28  ;;  %v1034_v60 = vsel %vm256_vm10, %v1030_v53, %v1032_v29 }
 0x26f   :  { %v1038_v32 = vsel %vm1894_vm6, %v1016_v31, %v1034_v60  ;;  %v1347_v5 = vld.sshfl [vmem:[#allocation1 + $0x10] sm:$0xff pattern:$0x75316420] }
 0x270   :  { %v1042_v54 = vrot.slane %v1038_v32, 4  ;;  %1374 = vst [vmem:[#allocation1 + $0x10] ss:$2 sm:$0xff] %v1369_v30  ;;  %v1125_v42 = vpop.permute.xlu2 %1124 }
 0x272   :  { %1046 = vst [vmem:[#allocation3 + $0x38] sm:$0xf0] %v1042_v54 }
 0x274   :  { %v1345_v13 = vld.sshfl [vmem:[#allocation1] sm:$0xff pattern:$0x75316420]  ;;  %v1346_v36 = vld.sshfl [vmem:[#allocation1 + $0x8] sm:$0xff pattern:$0x75316420] }
 0x275   :  { %1350 = vrot.lane.b32.xlu0 %v1346_v36, %s1735_s30  ;;  %1372 = vst [vmem:[#allocation1] ss:$2 sm:$0xff] %v2179_v50  ;;  %v1062_v38 = vpop.permute.xlu1 %1061  ;;  %v2261_v39 = vpop.permute.xlu0 %1059 }
 0x276   :  { %1352 = vrot.lane.b32.xlu1 %v1347_v5, %s1735_s30  ;;  %v1064_v47 = vsel %vm287_vm11, %v2261_v39, %v1062_v38 }
 0x277   :  { %v1377_v41 = vld.sshfl [vmem:[#allocation1 + $0x10] sm:$0xff pattern:$0x75316420] }
 0x278   :  { %1390 = vst [vmem:[#allocation1 + $0x10] ss:$2 sm:$0xff] %v1369_v30 }
 0x27c   :  { %v1376_v23 = vld.sshfl [vmem:[#allocation1 + $0x8] sm:$0xff pattern:$0x75316420]  ;;  %v1375_v43 = vld.sshfl [vmem:[#allocation1] sm:$0xff pattern:$0x75316420] }
 0x27d   :  { %1382 = vrot.lane.b32.xlu0 %v1377_v41, %s1736_s6  ;;  %1380 = vrot.lane.b32.xlu2 %v1376_v23, %s1736_s6  ;;  %1388 = vst [vmem:[#allocation1] ss:$2 sm:$0xff] %v2179_v50  ;;  %v1028_v48 = vpop.permute.xlu1 %1027  ;;  %v1078_v44 = vpop.permute.xlu0 %1077  ;;  %v1477_v41 = vld [vmem:[#allocation3 + $0x28] sm:$0xff] }
 0x27e   :  { %1378 = vrot.lane.b32.xlu1 %v1375_v43, %s1736_s6  ;;  %v1033_v28 = vsel %vm256_vm10, %v1028_v48, %v1030_v53  ;;  %v1080_v49 = vsel %vm178_vm8, %v2256_v37, %v1078_v44  ;;  %v1137_v59 = vpop.permute.xlu2 %1136  ;;  %v1473_v48 = vld [vmem:[#allocation3 + $0x68] sm:$0xff] }
 0x27f   :  { %v1037_v35 = vsel %vm1909_vm7, %v1015_v45, %v1033_v28  ;;  %v1084_v0 = vsel %vm1859_vm2, %v1064_v47, %v1080_v49  ;;  %v1393_v55 = vld.sshfl [vmem:[#allocation1 + $0x10] sm:$0xff pattern:$0x75316420] }
 0x280   :  { %v1041_v52 = vrot.slane %v1037_v35, 4  ;;  %1086 = vst [vmem:[#allocation3 + $0x70] sm:$0xf] %v1084_v0 }
 0x281   :  { %1415 = vst [vmem:[#allocation1 + $0x11] ss:$2 sm:$0xff] %v1409_v9 }
 0x282   :  { %1045 = vst [vmem:[#allocation3 + $0x60] sm:$0xf0] %v1041_v52 }
 0x284   :  { %v1392_v21 = vld.sshfl [vmem:[#allocation1 + $0x8] sm:$0xff pattern:$0x75316420]  ;;  %v1391_v56 = vld.sshfl [vmem:[#allocation1] sm:$0xff pattern:$0x75316420] }
 0x285   :  { %1348 = vrot.lane.b32.xlu0 %v1345_v13, %s1735_s30  ;;  %1398 = vrot.lane.b32.xlu2 %v1393_v55, %s1734_s29  ;;  %1413 = vst [vmem:[#allocation1 + $0x1] ss:$2 sm:$0xff] %v2179_v50  ;;  %v1103_v51 = vpop.permute.xlu1 %1102  ;;  %v2281_v58 = vpop.permute.xlu0 %1100  ;;  %v1481_v13 = vld [vmem:[#allocation3 + $0x38] sm:$0xff] }
 0x286   :  { %1396 = vrot.lane.b32.xlu1 %v1392_v21, %s1734_s29  ;;  %v1105_v61 = vsel %vm2429_vm12, %v2281_v58, %v1103_v51  ;;  %vm2431_vm12 = vmmov %vm2430_vm13 }
 0x287   :  { %1109 = vst [vmem:[#allocation3 + $0x70] sm:$0xf0] %v1105_v61 }
 0x288   :  { %v1418_v2 = vld.sshfl [vmem:[#allocation1 + $0x10] sm:$0xff pattern:$0x75316420] }
 0x289   :  { %1437 = vst [vmem:[#allocation1 + $0x10] ss:$2 sm:$0xff] %v1432_v62 }
 0x28c   :  { %v1417_v3 = vld.sshfl [vmem:[#allocation1 + $0x8] sm:$0xff pattern:$0x75316420]  ;;  %v1416_v4 = vld.sshfl [vmem:[#allocation1] sm:$0xff pattern:$0x75316420] }
 0x28d   :  { %1423 = vrot.lane.b32.xlu0 %v1418_v2, %s1737_s7  ;;  %1394 = vrot.lane.b32.xlu2 %v1391_v56, %s1734_s29  ;;  %1435 = vst [vmem:[#allocation1] ss:$2 sm:$0xff] %v2179_v50  ;;  %v1123_v6 = vpop.permute.xlu1 %1122 }
 0x28e   :  { %v1127_v18 = vsel %vm256_vm10, %v1123_v6, %v1125_v42  ;;  %v1485_v5 = vld [vmem:[#allocation3 + $0x70] sm:$0xff] }
 0x28f   :  { %v2288_v63 = vpop.permute.xlu2 %1184 }
 0x290   :  { %v1440_v24 = vld.sshfl [vmem:[#allocation1 + $0x10] sm:$0xff pattern:$0x75316420] }
 0x291   :  { %1445 = vrot.lane.b32.xlu1 %v1440_v24, %s1735_s30  ;;  %1453 = vst [vmem:[#allocation1 + $0x10] ss:$2 sm:$0xff] %v1432_v62 }
 0x294   :  { %v1439_v11 = vld.sshfl [vmem:[#allocation1 + $0x8] sm:$0xff pattern:$0x75316420]  ;;  %v1438_v14 = vld.sshfl [vmem:[#allocation1] sm:$0xff pattern:$0x75316420] }
 0x295   :  { %1421 = vrot.lane.b32.xlu2 %v1417_v3, %s1737_s7  ;;  %1419 = vrot.lane.b32.xlu0 %v1416_v4, %s1737_s7  ;;  %1451 = vst [vmem:[#allocation1] ss:$2 sm:$0xff] %v2179_v50  ;;  %v1141_v15 = vpop.permute.xlu1 %1140  ;;  %v1139_v17 = vpop.permute.xlu0 %1138 }
 0x296   :  { %v1143_v19 = vsel %vm2430_vm13, %v1139_v17, %v1141_v15  ;;  %v1142_v8 = vsel %vm2431_vm12, %v1137_v59, %v1139_v17 }
 0x297   :  { %v2296_v20 = vpop.permute.xlu2 %1209  ;;  %v1147_v22 = vsel %vm1894_vm6, %v1127_v18, %v1143_v19 }
 0x298   :  { %1149 = vst [vmem:[#allocation3 + $0x78] sm:$0xf] %v1147_v22  ;;  %v1456_v54 = vld.sshfl [vmem:[#allocation1 + $0x10] sm:$0xff pattern:$0x75316420] }
 0x29c   :  { %v1455_v26 = vld.sshfl [vmem:[#allocation1 + $0x8] sm:$0xff pattern:$0x75316420]  ;;  %v1454_v29 = vld.sshfl [vmem:[#allocation1] sm:$0xff pattern:$0x75316420] }
 0x29d   :  { %1443 = vrot.lane.b32.xlu0 %v1439_v11, %s1735_s30  ;;  %1459 = vrot.lane.b32.xlu2 %v1455_v26, %s1738_s8  ;;  %v1121_v50 = vpop.permute.xlu1 %1120 }
 0x29e   :  { %1457 = vrot.lane.b32.xlu1 %v1454_v29, %s1738_s8  ;;  %v1126_v53 = vsel %vm256_vm10, %v1121_v50, %v1123_v6 }
 0x29f   :  { %v2305_v30 = vpop.permute.xlu0 %1168  ;;  %v1146_v31 = vsel %vm1909_vm7, %v1126_v53, %v1142_v8  ;;  %v1232_v60 = vpop.permute.xlu2 %1231  ;;  %v1489_v32 = vld [vmem:[#allocation3 + $0x78] sm:$0xf] }
 0x2a0   :  { %1148 = vst [vmem:[#allocation3 + $0x8] sm:$0xf] %v1146_v31  ;;  %1649 = vmatpush.msk.msrb.mxu1 %vm724_vm14, %v1489_v32 }
 0x2a2   :  { %1545 = vmatpush.msrb.mxu1 %v1485_v5 }
 0x2a4   :  { %1546 = vmatpush.msrb.mxu1 %v1481_v13 }
 0x2a5   :  { %1461 = vrot.lane.b32.xlu0 %v1456_v54, %s1738_s8  ;;  %1057 = vrot.lane.b32.xlu2 %v2158_v27, %s1736_s6  ;;  %v1171_v36 = vpop.permute.xlu1 %1170 }
 0x2a6   :  { %1166 = vrot.lane.b32.xlu1 %v2189_v57, %s1729_s0  ;;  %v1173_v38 = vsel %vm68_vm0, %v2305_v30, %v1171_v36  ;;  %1547 = vmatpush.msrb.mxu1 %v1477_v41 }
 0x2a7   :  { %v1488_v43 = vld [vmem:[#allocation3 + $0x8] sm:$0xf] }
 0x2a8   :  { %v1187_v23 = vpop.permute.xlu0 %1186  ;;  %1647 = vmatpush.msk.msrb.mxu0 %vm724_vm14, %v1488_v43  ;;  %v1250_v44 = vpop.permute.xlu2 %1249  ;;  %1548 = vmatpush.msrb.mxu1 %v1473_v48 }
 0x2a9   :  { %v1189_v42 = vsel %vm85_vm1, %v2288_v63, %v1187_v23  ;;  %1650 = vmatmul.msk.f32.vlgmr.msrb.gmra.mxu1 %vm720_vm15, %v1471_v12 }
 0x2aa   :  { %v1193_v27 = vsel %vm1859_vm2, %v1173_v38, %v1189_v42 }
 0x2ab   :  { %1195 = vst [vmem:[#allocation3 + $0x80] sm:$0xf] %v1193_v27 }
 0x2ad   :  { %1441 = vrot.lane.b32.xlu0 %v1438_v14, %s1735_s30  ;;  %1182 = vrot.lane.b32.xlu2 %v2198_v7, %s1730_s25 }
 0x2ae   :  { %1207 = vrot.lane.b32.xlu1 %v2209_v25, %s1731_s26 }
 0x2b0   :  { %v1212_v57 = vpop.permute.xlu0 %1211  ;;  %v1246_v47 = vpop.permute.xlu2 %1245 }
 0x2b1   :  { %v1214_v45 = vsel %vm111_vm3, %v2296_v20, %v1212_v57 }
 0x2b2   :  { %1218 = vst [vmem:[#allocation3 + $0x80] sm:$0xf0] %v1214_v45 }
 0x2b5   :  { %1073 = vrot.lane.b32.xlu0 %v2163_v33, %s1734_s29 }
 0x2b7   :  { %v1230_v28 = vpop.permute.xlu1 %1229 }
 0x2b8   :  { %v1234_v49 = vpop.permute.xlu0 %1233  ;;  %v1276_v9 = vpop.permute.xlu2 %1275  ;;  %v1235_v25 = vsel %vm134_vm4, %v1230_v28, %v1232_v60 }
 0x2b9   :  { %v1236_v7 = vsel %vm134_vm4, %v1232_v60, %v1234_v49  ;;  %vm2432_vm4 = vcmask 916480  }
 0x2bd   :  { %1098 = vrot.lane.b32.xlu0 %v2170_v40, %s1737_s7 }
 0x2bf   :  { %v1248_v35 = vpop.permute.xlu1 %1247 }
 0x2c0   :  { %v1251_v0 = vsel %vm151_vm5, %v1246_v47, %v1248_v35  ;;  %v1252_v52 = vsel %vm151_vm5, %v1248_v35, %v1250_v44  ;;  %v1335_v56 = vpop.permute.xlu2 %1334 }
 0x2c1   :  { %v1255_v55 = vsel %vm1909_vm7, %v1235_v25, %v1251_v0  ;;  %v1256_v33 = vsel %vm1894_vm6, %v1236_v7, %v1252_v52 }
 0x2c2   :  { %1257 = vst [vmem:[#allocation3 + $0x18] sm:$0xf] %v1255_v55 }
 0x2c3   :  { %1258 = vst [vmem:[#allocation3 + $0x20] sm:$0xf] %v1256_v33 }
 0x2c7   :  { %v1274_v21 = vpop.permute.xlu1 %1273  ;;  %v1272_v40 = vpop.permute.xlu0 %1271 }
 0x2c8   :  { %v1278_v61 = vsel %vm178_vm8, %v1274_v21, %v1276_v9  ;;  %v1331_v2 = vpop.permute.xlu2 %1330  ;;  %v1277_v24 = vsel %vm178_vm8, %v1272_v40, %v1274_v21 }
 0x2cf   :  { %v1292_v51 = vpop.permute.xlu0 %1291 }
 0x2d0   :  { %v1294_v59 = vpop.permute.xlu1 %1293 }
 0x2d1   :  { %v1296_v62 = vsel %vm68_vm0, %v1292_v51, %v1294_v59 }
 0x2d2   :  { %v1300_v3 = vsel %vm1859_vm2, %v1278_v61, %v1296_v62 }
 0x2d3   :  { %v1304_v4 = vrot.slane %v1300_v3, 4 }
 0x2d5   :  { %1308 = vst [vmem:[#allocation3 + $0x20] sm:$0xf0] %v1304_v4 }
 0x2d7   :  { %v1381_v15 = vpop.permute.xlu2 %1380 }
 0x2d8   :  { %v1290_v6 = vpop.permute.xlu1 %1289 }
 0x2d9   :  { %v1295_v11 = vsel %vm68_vm0, %v1290_v6, %v1292_v51 }
 0x2da   :  { %v1299_v14 = vsel %vm1934_vm9, %v1277_v24, %v1295_v11 }
 0x2db   :  { %v1303_v17 = vrot.slane %v1299_v14, 4 }
 0x2dd   :  { %1307 = vst [vmem:[#allocation3 + $0x18] sm:$0xf0] %v1303_v17 }
 0x2df   :  { %v1399_v19 = vpop.permute.xlu2 %1398 }
 0x2e0   :  { %v1333_v18 = vpop.permute.xlu1 %1332 }
 0x2e1   :  { %v1337_v29 = vsel %vm151_vm5, %v1333_v18, %v1335_v56  ;;  %v1336_v54 = vsel %vm151_vm5, %v1331_v2, %v1333_v18  ;;  %vm2433_vm5 = vmmov %vm2432_vm4 }
 0x2e7   :  { %v1351_v22 = vpop.permute.xlu0 %1350  ;;  %v1395_v31 = vpop.permute.xlu2 %1394 }
 0x2e8   :  { %v1353_v26 = vpop.permute.xlu1 %1352 }
 0x2e9   :  { %v1355_v50 = vsel %vm256_vm10, %v1351_v22, %v1353_v26 }
 0x2ea   :  { %v1359_v8 = vsel %vm1894_vm6, %v1337_v29, %v1355_v50  ;;  %v1478_v29 = vld [vmem:[#allocation3 + $0x18] sm:$0xff] }
 0x2eb   :  { %v1363_v53 = vrot.slane %v1359_v8, 4  ;;  %v1480_v8 = vld [vmem:[#allocation3 + $0x60] sm:$0xff] }
 0x2ed   :  { %1367 = vst [vmem:[#allocation3 + $0x30] sm:$0xf0] %v1363_v53  ;;  %v1476_v53 = vld [vmem:[#allocation3 + $0x10] sm:$0xff] }
 0x2ef   :  { %v1383_v60 = vpop.permute.xlu0 %1382  ;;  %v1422_v36 = vpop.permute.xlu2 %1421 }
 0x2f0   :  { %v1379_v32 = vpop.permute.xlu1 %1378  ;;  %v1385_v13 = vsel %vm287_vm11, %v1381_v15, %v1383_v60 }
 0x2f1   :  { %v1384_v23 = vsel %vm287_vm11, %v1379_v32, %v1381_v15  ;;  %v1479_v15 = vld [vmem:[#allocation3 + $0x20] sm:$0xff] }
 0x2f4   :  { %v1483_v11 = vld [vmem:[#allocation3 + $0x30] sm:$0xff] }
 0x2f7   :  { %v1349_v5 = vpop.permute.xlu0 %1348  ;;  %v1460_v28 = vpop.permute.xlu2 %1459 }
 0x2f8   :  { %v1354_v38 = vsel %vm256_vm10, %v1349_v5, %v1351_v22  ;;  %v1397_v41 = vpop.permute.xlu1 %1396 }
 0x2f9   :  { %v1358_v43 = vsel %vm1909_vm7, %v1336_v54, %v1354_v38  ;;  %v1400_v42 = vsel %vm178_vm8, %v1395_v31, %v1397_v41  ;;  %v1401_v48 = vsel %vm178_vm8, %v1397_v41, %v1399_v19  ;;  %v1475_v19 = vld [vmem:[#allocation3 + $0x80] sm:$0xff] }
 0x2fa   :  { %v1362_v27 = vrot.slane %v1358_v43, 4  ;;  %v1404_v44 = vsel %vm1934_vm9, %v1384_v23, %v1400_v42  ;;  %v1405_v57 = vsel %vm1859_vm2, %v1385_v13, %v1401_v48  ;;  %vm2434_vm2 = vmmov %vm2431_vm12  ;;  %v1472_v31 = vld [vmem:[#allocation3] sm:$0xff] }
 0x2fb   :  { %1406 = vst [vmem:[#allocation3 + $0x40] sm:$0xf] %v1404_v44  ;;  %vm2435_vm13 = vmmov %vm2434_vm2 }
 0x2fc   :  { %1366 = vst [vmem:[#allocation3 + $0x98] sm:$0xf0] %v1362_v27 }
 0x2fd   :  { %1407 = vst [vmem:[#allocation3 + $0x88] sm:$0xf] %v1405_v57 }
 0x2ff   :  { %v1424_v45 = vpop.permute.xlu0 %1423  ;;  %v1058_v7 = vpop.permute.xlu2 %1057 }
 0x300   :  { %v1426_v47 = vsel %vm2432_vm4, %v1422_v36, %v1424_v45  ;;  %v1063_v17 = vsel %vm287_vm11, %v1058_v7, %v2261_v39 }
 0x301   :  { %1430 = vst [vmem:[#allocation3 + $0x88] sm:$0xf0] %v1426_v47 }
 0x303   :  { %v1446_v49 = vpop.permute.xlu1 %1445  ;;  %v1482_v26 = vld [vmem:[#allocation3 + $0x98] sm:$0xff] }
 0x307   :  { %v1420_v9 = vpop.permute.xlu0 %1419  ;;  %v1183_v52 = vpop.permute.xlu2 %1182 }
 0x308   :  { %v1425_v35 = vsel %vm2433_vm5, %v1420_v9, %v1422_v36  ;;  %v1188_v56 = vsel %vm85_vm1, %v1183_v52, %v2288_v63  ;;  %v1492_v63 = vld [vmem:[%s2417_s4] sm:$0xf]  ;;  %s1740_s4 = smov [#allocation7]  }
 0x309   :  { %1429 = vst [vmem:[#allocation3 + $0x40] sm:$0xf0] %v1425_v35  ;;  %1495 = vperm.xlu2 %1672, %v1492_v63   ;;  %v1487_v24 = vld [vmem:[#allocation3 + $0x88] sm:$0xff]  ;;  %s1624_s14 = sshll.u32 %s1740_s4, 4  ;;  %s1625_s14 = int_to_ptr.vmem [resolvable:$true] %s1624_s14 }
 0x30f   :  { %v1444_v25 = vpop.permute.xlu0 %1443 }
 0x310   :  { %v1458_v0 = vpop.permute.xlu1 %1457  ;;  %v1448_v33 = vsel %vm256_vm10, %v1444_v25, %v1446_v49  ;;  %v1486_v22 = vld [vmem:[#allocation3 + $0x40] sm:$0xff] }
 0x311   :  { %v1463_v2 = vsel %vm2435_vm13, %v1458_v0, %v1460_v28 }
 0x317   :  { %v1462_v55 = vpop.permute.xlu0 %1461 }
 0x318   :  { %v1464_v21 = vsel %vm2434_vm2, %v1460_v28, %v1462_v55  ;;  %v1167_v40 = vpop.permute.xlu1 %1166 }
 0x319   :  { %v1468_v51 = vsel %vm1894_vm6, %v1448_v33, %v1464_v21  ;;  %v1172_v59 = vsel %vm68_vm0, %v1167_v40, %v2305_v30  ;;  %vm2436_vm0 = vmmov %vm2432_vm4 }
 0x31a   :  { %1470 = vst [vmem:[#allocation3 + $0x90] sm:$0xf] %v1468_v51  ;;  %v1192_v61 = vsel %vm1934_vm9, %v1172_v59, %v1188_v56 }
 0x31b   :  { %1194 = vst [vmem:[#allocation3 + $0x48] sm:$0xf] %v1192_v61 }
 0x31f   :  { %v1442_v62 = vpop.permute.xlu0 %1441 }
 0x320   :  { %v1447_v3 = vsel %vm256_vm10, %v1442_v62, %v1444_v25  ;;  %v1208_v4 = vpop.permute.xlu1 %1207 }
 0x321   :  { %v1467_v34 = vsel %vm1909_vm7, %v1447_v3, %v1463_v2  ;;  %v1213_v30 = vsel %vm111_vm3, %v1208_v4, %v2296_v20  ;;  %v1491_v6 = vld [vmem:[#allocation3 + $0x90] sm:$0xf] }
 0x322   :  { %1469 = vst [vmem:[#allocation3 + $0x50] sm:$0xf] %v1467_v34  ;;  %1653 = vmatpush.msk.msrb.mxu3 %vm724_vm14, %v1491_v6 }
 0x323   :  { %1217 = vst [vmem:[#allocation3 + $0x48] sm:$0xf0] %v1213_v30 }
 0x324   :  { %1585 = vmatpush.msrb.mxu3 %v1487_v24 }
 0x326   :  { %1586 = vmatpush.msrb.mxu3 %v1483_v11  ;;  %v1550_v54 = vpop.f32.mrf.mxu1 }
 0x327   :  { %v1074_v14 = vpop.permute.xlu0 %1073 }
 0x328   :  { %v1079_v46 = vsel %vm178_vm8, %v1074_v14, %v2256_v37  ;;  %1587 = vmatpush.msrb.mxu3 %v1479_v15 }
 0x329   :  { %v1083_v20 = vsel %vm1934_vm9, %v1063_v17, %v1079_v46  ;;  %v1490_v18 = vld [vmem:[#allocation3 + $0x50] sm:$0xf] }
 0x32a   :  { %1085 = vst [vmem:[#allocation3 + $0x58] sm:$0xf] %v1083_v20  ;;  %1651 = vmatpush.msk.msrb.mxu2 %vm724_vm14, %v1490_v18  ;;  %1588 = vmatpush.msrb.mxu3 %v1475_v19  ;;  %v1474_v10 = vld [vmem:[#allocation3 + $0x48] sm:$0xff] }
 0x32b   :  { %1654 = vmatmul.msk.f32.vlgmr.msrb.gmra.mxu3 %vm720_vm15, %v1471_v12 }
 0x32c   :  { %1565 = vmatpush.msrb.mxu2 %v1486_v22 }
 0x32e   :  { %1566 = vmatpush.msrb.mxu2 %v1482_v26 }
 0x32f   :  { %v1099_v39 = vpop.permute.xlu0 %1098 }
 0x330   :  { %v1104_v37 = vsel %vm2436_vm0, %v1099_v39, %v2281_v58  ;;  %1567 = vmatpush.msrb.mxu2 %v1478_v29 }
 0x331   :  { %1108 = vst [vmem:[#allocation3 + $0x58] sm:$0xf0] %v1104_v37 }
 0x332   :  { %1568 = vmatpush.msrb.mxu2 %v1474_v10 }
 0x333   :  { %1652 = vmatmul.msk.f32.vlgmr.msrb.gmra.mxu2 %vm720_vm15, %v1471_v12 }
 0x338   :  { %v1484_v50 = vld [vmem:[#allocation3 + $0x58] sm:$0xff] }
 0x339   :  { %1525 = vmatpush.msrb.mxu0 %v1484_v50 }
 0x33b   :  { %1526 = vmatpush.msrb.mxu0 %v1480_v8 }
 0x33d   :  { %1527 = vmatpush.msrb.mxu0 %v1476_v53 }
 0x33f   :  { %1528 = vmatpush.msrb.mxu0 %v1472_v31 }
 0x340   :  { %1648 = vmatmul.msk.f32.vlgmr.msrb.gmra.mxu0 %vm720_vm15, %v1471_v12 }
 0x363   :  { %v1496_v60 = vpop.permute.xlu2 %1495 }
 0x364   :  { %v1551_v36 = vadd.f32 %v1550_v54, %v1496_v60 }
 0x366   :  { %v1598_v42 = vmul.f32 0.01, %v1551_v36  ;;  %vm1594_vm6 = vcmp.ge.f32.partialorder %v1551_v36, 0.0 }
 0x368   :  { %v1602_v45 = vsel %vm1594_vm6, %v1551_v36, %v1598_v42 }
 0x369   :  { %v1607_v49 = vrot.slane %v1602_v45, 4 }
 0x3ae   :  { %v1590_v32 = vpop.f32.mrf.mxu3 }
 0x3af   :  { %v1591_v5 = vadd.f32 %v1590_v32, %v1496_v60 }
 0x3b1   :  { %v1600_v58 = vmul.f32 0.01, %v1591_v5  ;;  %vm1596_vm1 = vcmp.ge.f32.partialorder %v1591_v5, 0.0 }
 0x3b3   :  { %v1604_v13 = vsel %vm1596_vm1, %v1591_v5, %v1600_v58 }
 0x3b4   :  { %v1614_v23 = vrot.slane %v1604_v13, 4 }
 0x3b6   :  { %v1570_v38 = vpop.f32.mrf.mxu2 }
 0x3b7   :  { %v1571_v41 = vadd.f32 %v1570_v38, %v1496_v60 }
 0x3b9   :  { %vm1595_vm3 = vcmp.ge.f32.partialorder %v1571_v41, 0.0  ;;  %v1599_v43 = vmul.f32 0.01, %v1571_v41 }
 0x3bb   :  { %v1603_v48 = vsel %vm1595_vm3, %v1571_v41, %v1599_v43 }
 0x3bc   :  { %v1615_v27 = vsel %vm724_vm14, %v1603_v48, %v1614_v23 }
 0x3bd   :  { %v1530_v44 = vpop.f32.mrf.mxu0  ;;  %v1617_v57 = vadd.f32 %v1615_v27, %v1798_v16 }
 0x3be   :  { %v1531_v47 = vadd.f32 %v1530_v44, %v1496_v60 }
 0x3bf   :  { %1619 = vst [vmem:[#allocation7 + $0x8] sm:$0xff] %v1617_v57 }
 0x3c0   :  { %vm1593_vm7 = vcmp.ge.f32.partialorder %v1531_v47, 0.0  ;;  %v1597_v28 = vmul.f32 0.01, %v1531_v47 }
 0x3c2   :  { %v1601_v9 = vsel %vm1593_vm7, %v1531_v47, %v1597_v28 }
 0x3c3   :  { %v1608_v35 = vsel %vm724_vm14, %v1601_v9, %v1607_v49 }
 0x3c4   :  { %v1610_v7 = vadd.f32 %v1608_v35, %v1777_v1 }
 0x3c6   :  { %1611 = vst [vmem:[#allocation7] sm:$0xff] %v1610_v7 }
 0x3c7   :  { %1632 = dma.vmem_to_hbm [thread:$0]  %s1625_s14, 256, %s1627_s17, [#allocation6], %s1726_s23, %s1726_s23, %s1727_s24  }
 0x3c8   :  { %1723 = dma.done.wait [#allocation6], 256  }
 0x3c9   :  { %1724 = vsyncadd [#allocation6], 4294967040 }
 0x3ca   :  { %1637 = vsyncpa [#allocation5], 1 }
 0x3cb   :  { %1638 = vsyncpa [#allocation6], 1 }

</bundles_post_ra>
